<compile_context>
chip_gen: v5e
topology: v5e:2x2
jax: 0.10.0
libtpu: 0.0.40
codegen_flags: <defaults>
</compile_context>

<pallas_src>
from functools import partial

import jax
import jax.numpy as jnp
import numpy as np
from jax.experimental import pallas as pl
from jax.experimental.pallas import tpu as pltpu

_EPS = 1e-5


# ----------------------------------------------------------------------------
# Fused kernel: up-conv + IN + ReLU + pad/concat + ResBlock, per batch sample
# ----------------------------------------------------------------------------
def _make_up_resblock_kernel(Wp, n_up, n_hw, downsample):
    inv_up = 1.0 / float(n_up)     # pixels of the upsampled (2H1 x 2W1) map
    inv_hw = 1.0 / float(n_hw)     # pixels of the interior (H2 x W2) map
    # 3x3 tap offsets on the flattened (Hp, Wp) halo grid, kh-major / kw-minor
    # (matches the (Cout, 9*Cin) weight layout built in the wrapper).
    shifts = [(kh - 1) * Wp + (kw - 1) for kh in range(3) for kw in range(3)]

    def kernel(x1_ref, x2_ref, a_ref, sy_ref, sx_ref, sg_ref, mask_ref,
               w1x1_ref, w1_ref, w2_ref, o_ref):
        f32 = jnp.float32
        cdt = x1_ref.dtype

        masks = mask_ref[...]                       # (2, R_pad) f32
        mask_in = masks[0:1, :]                     # interior H2 x W2
        mask_up = masks[1:2, :]                     # upsampled 2H1 x 2W1 region

        def leaky(v):
            return jnp.where(v >= 0.0, v, 0.2 * v)

        def inorm(v, premasked):
            # single-pass InstanceNorm stats over the H2*W2 interior pixels
            vm = v if premasked else v * mask_in
            mu = jnp.sum(vm, axis=1, keepdims=True) * inv_hw
            var = jnp.sum(vm * vm, axis=1, keepdims=True) * inv_hw - mu * mu
            return (v - mu) * jax.lax.rsqrt(var + _EPS)

        def lane_shift(v, s):
            # out[:, r] = v[:, r + s]; interior lanes never wrap, wrapped lanes
            # are halo/pad lanes that stay masked.  Static jnp.roll lowers to
            # two lane slices + a concat; only 9 shifts per conv (the whole
            # channel-concat block is shifted once per tap).
            # TODO(synk): switch to pltpu.roll (single XLU rotate) once its
            # rotate direction is pinned on the target jax version.
            return v if s == 0 else jnp.roll(v, -s, axis=1)

        def im2col(v):                              # (C, R_pad) -> (9C, R_pad)
            return jnp.concatenate([lane_shift(v, s) for s in shifts], axis=0)

        # ---- up path: sub-pixel scatter of x1 (one-hot matmuls) + fused
        #      ConvTranspose2d(k=2,s=2) as ONE matmul + IN + ReLU -------------
        x1 = x1_ref[0]                                              # (Cu, M1)
        xs = jnp.concatenate(
            [jnp.dot(x1, sy_ref[t], preferred_element_type=f32)
             for t in range(4)], axis=0).astype(cdt)                # (4Cu, R_pad)
        ys = jnp.dot(a_ref[...], xs, preferred_element_type=f32)    # (Cu, R_pad)
        mu = jnp.sum(ys, axis=1, keepdims=True) * inv_up
        var = jnp.sum(ys * ys, axis=1, keepdims=True) * inv_up - mu * mu
        yu = jnp.maximum((ys - mu) * jax.lax.rsqrt(var + _EPS), 0.0) * mask_up

        # ---- x2 halo scatter + channel concat (sublanes) --------------------
        x2s = jnp.dot(x2_ref[0], sx_ref[...],
                      preferred_element_type=f32)                   # (Cs, R_pad)
        cat = jnp.concatenate([x2s, yu], axis=0).astype(cdt)        # (Cin, R_pad)

        # ---- skip path: 1x1 conv + IN (or identity) -------------------------
        if downsample:
            skip = inorm(jnp.dot(w1x1_ref[...], cat,
                                 preferred_element_type=f32), premasked=True)
        else:
            skip = cat.astype(f32)

        # ---- conv3x3 #1 + IN + LeakyReLU: single K=9*Cin matmul -------------
        h = jnp.dot(w1_ref[...], im2col(cat), preferred_element_type=f32)
        h = (leaky(inorm(h, premasked=False)) * mask_in).astype(cdt)

        # ---- conv3x3 #2 + IN: single K=9*Cout matmul ------------------------
        h2 = jnp.dot(w2_ref[...], im2col(h), preferred_element_type=f32)
        h2 = inorm(h2, premasked=False)

        # ---- residual add + LeakyReLU, crop halo via one-hot gather ---------
        out = leaky(skip + h2).astype(cdt)                          # (Cout, R_pad)
        o_ref[0] = jnp.dot(out, sg_ref[...],
                           preferred_element_type=f32).astype(o_ref.dtype)

    return kernel


# ----------------------------------------------------------------------------
# Constant one-hot scatter / gather matrices and validity masks (shape-only)
# ----------------------------------------------------------------------------
def _one_hot_consts(H1, W1, H2, W2, Wp, R_pad):
    M1, M2 = H1 * W1, H2 * W2
    sy = np.zeros((4, M1, R_pad), np.float32)      # sub-pixel scatter, per tap
    i1, j1 = np.meshgrid(np.arange(H1), np.arange(W1), indexing="ij")
    src1 = (i1 * W1 + j1).reshape(-1)
    for kh in range(2):
        for kw in range(2):
            tgt = ((2 * i1 + kh + 1) * Wp + (2 * j1 + kw + 1)).reshape(-1)
            sy[2 * kh + kw, src1, tgt] = 1.0
    i2, j2 = np.meshgrid(np.arange(H2), np.arange(W2), indexing="ij")
    src2 = (i2 * W2 + j2).reshape(-1)
    tgt2 = ((i2 + 1) * Wp + (j2 + 1)).reshape(-1)
    sx = np.zeros((M2, R_pad), np.float32)         # interior -> halo grid
    sx[src2, tgt2] = 1.0
    sg = np.ascontiguousarray(sx.T)                # halo grid -> interior
    mask = np.zeros((2, R_pad), np.float32)
    mask[0, tgt2] = 1.0                            # interior H2 x W2
    mask[1] = sy.sum(axis=(0, 1))                  # upsampled 2H1 x 2W1 region
    return sy, sx, sg, mask


# ----------------------------------------------------------------------------
# Wrapper: only free reshapes + weight re-layout around a single pallas_call
# ----------------------------------------------------------------------------
@partial(jax.jit, static_argnames=("use_bf16",))
def up_forward(x1, x2, params, use_bf16=False):
    """x1: (N, Cu, H1, W1), x2: (N, Cs, H2, W2) NCHW -> (N, Cout, H2, W2)."""
    N, Cu, H1, W1 = x1.shape
    _, Cs, H2, W2 = x2.shape
    assert 2 * H1 <= H2 and 2 * W1 <= W2
    M1, M2 = H1 * W1, H2 * W2
    Hp, Wp = H2 + 2, W2 + 2
    R_pad = ((Hp * Wp + 127) // 128) * 128          # lane-dense flattened halo grid
    Cout = params["w1"].shape[0]
    Cin = Cs + Cu
    downsample = (Cin != Cout)

    cdt = jnp.bfloat16 if use_bf16 else x1.dtype
    sy, sx, sg, mask = _one_hot_consts(H1, W1, H2, W2, Wp, R_pad)

    # PyTorch-layout weights -> fat matmul layouts (biases feeding an
    # InstanceNorm are dropped: exactly cancelled by the mean subtraction).
    a_flat = jnp.transpose(params["up_w"], (1, 2, 3, 0)).reshape(Cu, 4 * Cu)
    w1_fat = jnp.transpose(params["w1"], (0, 2, 3, 1)).reshape(Cout, 9 * Cin)
    w2_fat = jnp.transpose(params["w2"], (0, 2, 3, 1)).reshape(Cout, 9 * Cout)
    w1x1 = params["w1x1"].reshape(Cout, Cin)

    kernel = _make_up_resblock_kernel(Wp, n_up=4 * M1, n_hw=M2,
                                      downsample=downsample)
    out = pl.pallas_call(
        kernel,
        out_shape=jax.ShapeDtypeStruct((N, Cout, M2), cdt),
        grid=(N,),
        in_specs=[
            pl.BlockSpec((1, Cu, M1), lambda n: (n, 0, 0)),      # x1
            pl.BlockSpec((1, Cs, M2), lambda n: (n, 0, 0)),      # x2
            pl.BlockSpec((Cu, 4 * Cu), lambda n: (0, 0)),        # convT weights
            pl.BlockSpec((4, M1, R_pad), lambda n: (0, 0, 0)),   # sub-pixel scatter
            pl.BlockSpec((M2, R_pad), lambda n: (0, 0)),         # halo scatter
            pl.BlockSpec((R_pad, M2), lambda n: (0, 0)),         # interior gather
            pl.BlockSpec((2, R_pad), lambda n: (0, 0)),          # validity masks
            pl.BlockSpec((Cout, Cin), lambda n: (0, 0)),         # 1x1 skip weights
            pl.BlockSpec((Cout, 9 * Cin), lambda n: (0, 0)),     # conv1 weights
            pl.BlockSpec((Cout, 9 * Cout), lambda n: (0, 0)),    # conv2 weights
        ],
        out_specs=pl.BlockSpec((1, Cout, M2), lambda n: (n, 0, 0)),
        compiler_params=pltpu.CompilerParams(dimension_semantics=("parallel",)),
    )(
        x1.reshape(N, Cu, M1).astype(cdt),
        x2.reshape(N, Cs, M2).astype(cdt),
        a_flat.astype(cdt),
        jnp.asarray(sy, dtype=cdt),
        jnp.asarray(sx, dtype=cdt),
        jnp.asarray(sg, dtype=cdt),
        jnp.asarray(mask, dtype=jnp.float32),
        w1x1.astype(cdt),
        w1_fat.astype(cdt),
        w2_fat.astype(cdt),
    )
    return out.reshape(N, Cout, H2, W2)


# ----------------------------------------------------------------------------
# Pure-JAX reference (correctness checking only; uses the biases)
# ----------------------------------------------------------------------------
def _inorm_ref(x):
    m = x.mean(axis=(2, 3), keepdims=True)
    v = ((x - m) ** 2).mean(axis=(2, 3), keepdims=True)
    return (x - m) * jax.lax.rsqrt(v + _EPS)


def _leaky_ref(x):
    return jnp.where(x >= 0.0, x, 0.2 * x)


def _conv_ref(x, w, b, pad):
    out = jax.lax.conv_general_dilated(
        x, w, (1, 1), ((pad, pad), (pad, pad)),
        dimension_numbers=("NCHW", "OIHW", "NCHW"),
        precision=jax.lax.Precision.HIGHEST)
    return out + b[None, :, None, None]


def up_ref(x1, x2, params):
    N, Cu, H1, W1 = x1.shape
    _, Cs, H2, W2 = x2.shape
    wt, bt = params["up_w"], params["up_b"]
    t = jnp.einsum("nchw,cokl->nohkwl", x1, wt,
                   precision=jax.lax.Precision.HIGHEST)
    y = t.reshape(N, Cu, 2 * H1, 2 * W1) + bt[None, :, None, None]
    y = jnp.maximum(_inorm_ref(y), 0.0)
    y = jnp.pad(y, ((0, 0), (0, 0), (0, H2 - 2 * H1), (0, W2 - 2 * W1)))
    x = jnp.concatenate([x2, y], axis=1)
    Cin = x.shape[1]
    Cout = params["w1"].shape[0]
    if Cin != Cout:
        skip = _inorm_ref(_conv_ref(x, params["w1x1"], params["b1x1"], 0))
    else:
        skip = x
    h = _leaky_ref(_inorm_ref(_conv_ref(x, params["w1"], params["b1"], 1)))
    h = _inorm_ref(_conv_ref(h, params["w2"], params["b2"], 1))
    return _leaky_ref(skip + h)


# ----------------------------------------------------------------------------
if __name__ == "__main__":
    key = jax.random.PRNGKey(0)
    ks = jax.random.split(key, 10)

    N, Cu, Cs, Cout = 2, 4, 4, 16
    H1 = W1 = 8           # x1 spatial; upsampled to 16x16
    H2 = W2 = 16          # x2 spatial
    Cin = Cu + Cs

    x1 = jax.random.normal(ks[0], (N, Cu, H1, W1), jnp.float32)
    x2 = jax.random.normal(ks[1], (N, Cs, H2, W2), jnp.float32)

    # Deterministic synthetic parameters (PyTorch layouts).
    params = {
        "up_w": 0.3 * jax.random.normal(ks[2], (Cu, Cu, 2, 2), jnp.float32),
        "up_b": 0.1 * jax.random.normal(ks[3], (Cu,), jnp.float32),
        "w1":   0.2 * jax.random.normal(ks[4], (Cout, Cin, 3, 3), jnp.float32),
        "b1":   0.1 * jax.random.normal(ks[5], (Cout,), jnp.float32),
        "w2":   0.2 * jax.random.normal(ks[6], (Cout, Cout, 3, 3), jnp.float32),
        "b2":   0.1 * jax.random.normal(ks[7], (Cout,), jnp.float32),
        "w1x1": 0.3 * jax.random.normal(ks[8], (Cout, Cin, 1, 1), jnp.float32),
        "b1x1": 0.1 * jax.random.normal(ks[9], (Cout,), jnp.float32),
    }

    out = jax.block_until_ready(up_forward(x1, x2, params))
    assert out.shape == (N, Cout, H2, W2), out.shape

    ref = jax.block_until_ready(up_ref(x1, x2, params))
    np.testing.assert_allclose(np.asarray(out), np.asarray(ref),
                               atol=3e-3, rtol=3e-3)

    print("KERNEL_OK")
</pallas_src>

<mosaic_0001>
module attributes {stable_mosaic.version = 11 : i64} {
  func.func @kernel(%arg0: i32, %arg1: memref<1x4x64xf32, #tpu.memory_space<vmem>>, %arg2: memref<1x4x256xf32, #tpu.memory_space<vmem>>, %arg3: memref<4x16xf32, #tpu.memory_space<vmem>>, %arg4: memref<4x64x384xf32, #tpu.memory_space<vmem>>, %arg5: memref<256x384xf32, #tpu.memory_space<vmem>>, %arg6: memref<384x256xf32, #tpu.memory_space<vmem>>, %arg7: memref<2x384xf32, #tpu.memory_space<vmem>>, %arg8: memref<16x8xf32, #tpu.memory_space<vmem>>, %arg9: memref<16x72xf32, #tpu.memory_space<vmem>>, %arg10: memref<16x144xf32, #tpu.memory_space<vmem>>, %arg11: memref<1x16x256xf32, #tpu.memory_space<vmem>>) attributes {dimension_semantics = [#tpu.dimension_semantics<parallel>], iteration_bounds = array<i64: 2>, scalar_prefetch = 0 : i64, scratch_operands = 0 : i64, tpu.core_type = #tpu.core_type<tc>, window_params = [{transform_indices = @transform_0, window_bounds = array<i64: 1, 4, 64>}, {transform_indices = @transform_1, window_bounds = array<i64: 1, 4, 256>}, {pipeline_mode = #tpu.pipeline_mode<synchronous>, transform_indices = @transform_2, window_bounds = array<i64: 4, 16>}, {pipeline_mode = #tpu.pipeline_mode<synchronous>, transform_indices = @transform_3, window_bounds = array<i64: 4, 64, 384>}, {pipeline_mode = #tpu.pipeline_mode<synchronous>, transform_indices = @transform_4, window_bounds = array<i64: 256, 384>}, {pipeline_mode = #tpu.pipeline_mode<synchronous>, transform_indices = @transform_5, window_bounds = array<i64: 384, 256>}, {pipeline_mode = #tpu.pipeline_mode<synchronous>, transform_indices = @transform_6, window_bounds = array<i64: 2, 384>}, {pipeline_mode = #tpu.pipeline_mode<synchronous>, transform_indices = @transform_7, window_bounds = array<i64: 16, 8>}, {pipeline_mode = #tpu.pipeline_mode<synchronous>, transform_indices = @transform_8, window_bounds = array<i64: 16, 72>}, {pipeline_mode = #tpu.pipeline_mode<synchronous>, transform_indices = @transform_9, window_bounds = array<i64: 16, 144>}, {transform_indices = @transform_10, window_bounds = array<i64: 1, 16, 256>}]} {
    %c0 = arith.constant 0 : index
    %c0_0 = arith.constant 0 : index
    %0 = vector.load %arg7[%c0, %c0_0] : memref<2x384xf32, #tpu.memory_space<vmem>>, vector<2x384xf32>
    %1 = vector.extract_strided_slice %0 {offsets = [0, 0], sizes = [1, 384], strides = [1, 1]} : vector<2x384xf32> to vector<1x384xf32>
    %2 = vector.extract_strided_slice %0 {offsets = [1, 0], sizes = [1, 384], strides = [1, 1]} : vector<2x384xf32> to vector<1x384xf32>
    %c0_1 = arith.constant 0 : index
    %c0_2 = arith.constant 0 : index
    %c0_3 = arith.constant 0 : index
    %3 = vector.load %arg1[%c0_1, %c0_2, %c0_3] : memref<1x4x64xf32, #tpu.memory_space<vmem>>, vector<1x4x64xf32>
    %4 = vector.shape_cast %3 : vector<1x4x64xf32> to vector<4x64xf32>
    %c0_4 = arith.constant 0 : index
    %c0_5 = arith.constant 0 : index
    %c0_6 = arith.constant 0 : index
    %5 = vector.load %arg4[%c0_4, %c0_5, %c0_6] : memref<4x64x384xf32, #tpu.memory_space<vmem>>, vector<1x64x384xf32>
    %6 = vector.shape_cast %5 : vector<1x64x384xf32> to vector<64x384xf32>
    %cst = arith.constant dense<0.000000e+00> : vector<4x384xf32>
    %7 = tpu.matmul %4, %6, %cst {dimension_numbers = #tpu.dot_dimension_numbers<[1], [0], [0], [1], [0, 0, 1, 1], [], []>} : vector<4x64xf32>, vector<64x384xf32>, vector<4x384xf32> -> vector<4x384xf32>
    %c1 = arith.constant 1 : index
    %c0_7 = arith.constant 0 : index
    %c0_8 = arith.constant 0 : index
    %8 = vector.load %arg4[%c1, %c0_7, %c0_8] : memref<4x64x384xf32, #tpu.memory_space<vmem>>, vector<1x64x384xf32>
    %9 = vector.shape_cast %8 : vector<1x64x384xf32> to vector<64x384xf32>
    %cst_9 = arith.constant dense<0.000000e+00> : vector<4x384xf32>
    %10 = tpu.matmul %4, %9, %cst_9 {dimension_numbers = #tpu.dot_dimension_numbers<[1], [0], [0], [1], [0, 0, 1, 1], [], []>} : vector<4x64xf32>, vector<64x384xf32>, vector<4x384xf32> -> vector<4x384xf32>
    %c2 = arith.constant 2 : index
    %c0_10 = arith.constant 0 : index
    %c0_11 = arith.constant 0 : index
    %11 = vector.load %arg4[%c2, %c0_10, %c0_11] : memref<4x64x384xf32, #tpu.memory_space<vmem>>, vector<1x64x384xf32>
    %12 = vector.shape_cast %11 : vector<1x64x384xf32> to vector<64x384xf32>
    %cst_12 = arith.constant dense<0.000000e+00> : vector<4x384xf32>
    %13 = tpu.matmul %4, %12, %cst_12 {dimension_numbers = #tpu.dot_dimension_numbers<[1], [0], [0], [1], [0, 0, 1, 1], [], []>} : vector<4x64xf32>, vector<64x384xf32>, vector<4x384xf32> -> vector<4x384xf32>
    %c3 = arith.constant 3 : index
    %c0_13 = arith.constant 0 : index
    %c0_14 = arith.constant 0 : index
    %14 = vector.load %arg4[%c3, %c0_13, %c0_14] : memref<4x64x384xf32, #tpu.memory_space<vmem>>, vector<1x64x384xf32>
    %15 = vector.shape_cast %14 : vector<1x64x384xf32> to vector<64x384xf32>
    %cst_15 = arith.constant dense<0.000000e+00> : vector<4x384xf32>
    %16 = tpu.matmul %4, %15, %cst_15 {dimension_numbers = #tpu.dot_dimension_numbers<[1], [0], [0], [1], [0, 0, 1, 1], [], []>} : vector<4x64xf32>, vector<64x384xf32>, vector<4x384xf32> -> vector<4x384xf32>
    %17 = tpu.concatenate %7, %10, %13, %16 in 0 : vector<4x384xf32>, vector<4x384xf32>, vector<4x384xf32>, vector<4x384xf32> -> vector<16x384xf32>
    %c0_16 = arith.constant 0 : index
    %c0_17 = arith.constant 0 : index
    %18 = vector.load %arg3[%c0_16, %c0_17] : memref<4x16xf32, #tpu.memory_space<vmem>>, vector<4x16xf32>
    %cst_18 = arith.constant dense<0.000000e+00> : vector<4x384xf32>
    %19 = tpu.matmul %18, %17, %cst_18 {dimension_numbers = #tpu.dot_dimension_numbers<[1], [0], [0], [1], [0, 0, 1, 1], [], []>} : vector<4x16xf32>, vector<16x384xf32>, vector<4x384xf32> -> vector<4x384xf32>
    %cst_19 = arith.constant dense<0.000000e+00> : vector<4xf32>
    %20 = vector.multi_reduction <add>, %19, %cst_19 [1] : vector<4x384xf32> to vector<4xf32>
    %21 = vector.shape_cast %20 : vector<4xf32> to vector<4x1xf32>
    %cst_20 = arith.constant 3.906250e-03 : f32
    %22 = vector.broadcast %cst_20 : f32 to vector<4x1xf32>
    %23 = arith.mulf %21, %22 : vector<4x1xf32>
    %24 = arith.mulf %19, %19 : vector<4x384xf32>
    %cst_21 = arith.constant dense<0.000000e+00> : vector<4xf32>
    %25 = vector.multi_reduction <add>, %24, %cst_21 [1] : vector<4x384xf32> to vector<4xf32>
    %26 = vector.shape_cast %25 : vector<4xf32> to vector<4x1xf32>
    %cst_22 = arith.constant 3.906250e-03 : f32
    %27 = vector.broadcast %cst_22 : f32 to vector<4x1xf32>
    %28 = arith.mulf %26, %27 : vector<4x1xf32>
    %29 = arith.mulf %23, %23 : vector<4x1xf32>
    %30 = arith.subf %28, %29 : vector<4x1xf32>
    %31 = vector.broadcast %23 : vector<4x1xf32> to vector<4x384xf32>
    %32 = arith.subf %19, %31 : vector<4x384xf32>
    %cst_23 = arith.constant 9.99999974E-6 : f32
    %33 = vector.broadcast %cst_23 : f32 to vector<4x1xf32>
    %34 = arith.addf %30, %33 : vector<4x1xf32>
    %35 = math.rsqrt %34 : vector<4x1xf32>
    %36 = vector.broadcast %35 : vector<4x1xf32> to vector<4x384xf32>
    %37 = arith.mulf %32, %36 : vector<4x384xf32>
    %cst_24 = arith.constant 0.000000e+00 : f32
    %38 = vector.broadcast %cst_24 : f32 to vector<4x384xf32>
    %39 = arith.maximumf %37, %38 : vector<4x384xf32>
    %40 = vector.broadcast %2 : vector<1x384xf32> to vector<4x384xf32>
    %41 = arith.mulf %39, %40 : vector<4x384xf32>
    %c0_25 = arith.constant 0 : index
    %c0_26 = arith.constant 0 : index
    %c0_27 = arith.constant 0 : index
    %42 = vector.load %arg2[%c0_25, %c0_26, %c0_27] : memref<1x4x256xf32, #tpu.memory_space<vmem>>, vector<1x4x256xf32>
    %43 = vector.shape_cast %42 : vector<1x4x256xf32> to vector<4x256xf32>
    %c0_28 = arith.constant 0 : index
    %c0_29 = arith.constant 0 : index
    %44 = vector.load %arg5[%c0_28, %c0_29] : memref<256x384xf32, #tpu.memory_space<vmem>>, vector<256x384xf32>
    %cst_30 = arith.constant dense<0.000000e+00> : vector<4x384xf32>
    %45 = tpu.matmul %43, %44, %cst_30 {dimension_numbers = #tpu.dot_dimension_numbers<[1], [0], [0], [1], [0, 0, 1, 1], [], []>} : vector<4x256xf32>, vector<256x384xf32>, vector<4x384xf32> -> vector<4x384xf32>
    %46 = tpu.concatenate %45, %41 in 0 : vector<4x384xf32>, vector<4x384xf32> -> vector<8x384xf32>
    %c0_31 = arith.constant 0 : index
    %c0_32 = arith.constant 0 : index
    %47 = vector.load %arg8[%c0_31, %c0_32] : memref<16x8xf32, #tpu.memory_space<vmem>>, vector<16x8xf32>
    %cst_33 = arith.constant dense<0.000000e+00> : vector<16x384xf32>
    %48 = tpu.matmul %47, %46, %cst_33 {dimension_numbers = #tpu.dot_dimension_numbers<[1], [0], [0], [1], [0, 0, 1, 1], [], []>} : vector<16x8xf32>, vector<8x384xf32>, vector<16x384xf32> -> vector<16x384xf32>
    %cst_34 = arith.constant dense<0.000000e+00> : vector<16xf32>
    %49 = vector.multi_reduction <add>, %48, %cst_34 [1] : vector<16x384xf32> to vector<16xf32>
    %50 = vector.shape_cast %49 : vector<16xf32> to vector<16x1xf32>
    %cst_35 = arith.constant 3.906250e-03 : f32
    %51 = vector.broadcast %cst_35 : f32 to vector<16x1xf32>
    %52 = arith.mulf %50, %51 : vector<16x1xf32>
    %53 = arith.mulf %48, %48 : vector<16x384xf32>
    %cst_36 = arith.constant dense<0.000000e+00> : vector<16xf32>
    %54 = vector.multi_reduction <add>, %53, %cst_36 [1] : vector<16x384xf32> to vector<16xf32>
    %55 = vector.shape_cast %54 : vector<16xf32> to vector<16x1xf32>
    %cst_37 = arith.constant 3.906250e-03 : f32
    %56 = vector.broadcast %cst_37 : f32 to vector<16x1xf32>
    %57 = arith.mulf %55, %56 : vector<16x1xf32>
    %58 = arith.mulf %52, %52 : vector<16x1xf32>
    %59 = arith.subf %57, %58 : vector<16x1xf32>
    %60 = vector.broadcast %52 : vector<16x1xf32> to vector<16x384xf32>
    %61 = arith.subf %48, %60 : vector<16x384xf32>
    %cst_38 = arith.constant 9.99999974E-6 : f32
    %62 = vector.broadcast %cst_38 : f32 to vector<16x1xf32>
    %63 = arith.addf %59, %62 : vector<16x1xf32>
    %64 = math.rsqrt %63 : vector<16x1xf32>
    %65 = vector.broadcast %64 : vector<16x1xf32> to vector<16x384xf32>
    %66 = arith.mulf %61, %65 : vector<16x384xf32>
    %c0_39 = arith.constant 0 : index
    %c0_40 = arith.constant 0 : index
    %67 = vector.load %arg9[%c0_39, %c0_40] : memref<16x72xf32, #tpu.memory_space<vmem>>, vector<16x72xf32>
    %68 = vector.extract_strided_slice %46 {offsets = [0, 365], sizes = [8, 19], strides = [1, 1]} : vector<8x384xf32> to vector<8x19xf32>
    %69 = vector.extract_strided_slice %46 {offsets = [0, 0], sizes = [8, 365], strides = [1, 1]} : vector<8x384xf32> to vector<8x365xf32>
    %70 = tpu.concatenate %68, %69 in 1 : vector<8x19xf32>, vector<8x365xf32> -> vector<8x384xf32>
    %71 = vector.extract_strided_slice %46 {offsets = [0, 366], sizes = [8, 18], strides = [1, 1]} : vector<8x384xf32> to vector<8x18xf32>
    %72 = vector.extract_strided_slice %46 {offsets = [0, 0], sizes = [8, 366], strides = [1, 1]} : vector<8x384xf32> to vector<8x366xf32>
    %73 = tpu.concatenate %71, %72 in 1 : vector<8x18xf32>, vector<8x366xf32> -> vector<8x384xf32>
    %74 = vector.extract_strided_slice %46 {offsets = [0, 367], sizes = [8, 17], strides = [1, 1]} : vector<8x384xf32> to vector<8x17xf32>
    %75 = vector.extract_strided_slice %46 {offsets = [0, 0], sizes = [8, 367], strides = [1, 1]} : vector<8x384xf32> to vector<8x367xf32>
    %76 = tpu.concatenate %74, %75 in 1 : vector<8x17xf32>, vector<8x367xf32> -> vector<8x384xf32>
    %77 = vector.extract_strided_slice %46 {offsets = [0, 383], sizes = [8, 1], strides = [1, 1]} : vector<8x384xf32> to vector<8x1xf32>
    %78 = vector.extract_strided_slice %46 {offsets = [0, 0], sizes = [8, 383], strides = [1, 1]} : vector<8x384xf32> to vector<8x383xf32>
    %79 = tpu.concatenate %77, %78 in 1 : vector<8x1xf32>, vector<8x383xf32> -> vector<8x384xf32>
    %80 = vector.extract_strided_slice %46 {offsets = [0, 1], sizes = [8, 383], strides = [1, 1]} : vector<8x384xf32> to vector<8x383xf32>
    %81 = vector.extract_strided_slice %46 {offsets = [0, 0], sizes = [8, 1], strides = [1, 1]} : vector<8x384xf32> to vector<8x1xf32>
    %82 = tpu.concatenate %80, %81 in 1 : vector<8x383xf32>, vector<8x1xf32> -> vector<8x384xf32>
    %83 = vector.extract_strided_slice %46 {offsets = [0, 17], sizes = [8, 367], strides = [1, 1]} : vector<8x384xf32> to vector<8x367xf32>
    %84 = vector.extract_strided_slice %46 {offsets = [0, 0], sizes = [8, 17], strides = [1, 1]} : vector<8x384xf32> to vector<8x17xf32>
    %85 = tpu.concatenate %83, %84 in 1 : vector<8x367xf32>, vector<8x17xf32> -> vector<8x384xf32>
    %86 = vector.extract_strided_slice %46 {offsets = [0, 18], sizes = [8, 366], strides = [1, 1]} : vector<8x384xf32> to vector<8x366xf32>
    %87 = vector.extract_strided_slice %46 {offsets = [0, 0], sizes = [8, 18], strides = [1, 1]} : vector<8x384xf32> to vector<8x18xf32>
    %88 = tpu.concatenate %86, %87 in 1 : vector<8x366xf32>, vector<8x18xf32> -> vector<8x384xf32>
    %89 = vector.extract_strided_slice %46 {offsets = [0, 19], sizes = [8, 365], strides = [1, 1]} : vector<8x384xf32> to vector<8x365xf32>
    %90 = vector.extract_strided_slice %46 {offsets = [0, 0], sizes = [8, 19], strides = [1, 1]} : vector<8x384xf32> to vector<8x19xf32>
    %91 = tpu.concatenate %89, %90 in 1 : vector<8x365xf32>, vector<8x19xf32> -> vector<8x384xf32>
    %92 = tpu.concatenate %70, %73, %76, %79, %46, %82, %85, %88, %91 in 0 : vector<8x384xf32>, vector<8x384xf32>, vector<8x384xf32>, vector<8x384xf32>, vector<8x384xf32>, vector<8x384xf32>, vector<8x384xf32>, vector<8x384xf32>, vector<8x384xf32> -> vector<72x384xf32>
    %cst_41 = arith.constant dense<0.000000e+00> : vector<16x384xf32>
    %93 = tpu.matmul %67, %92, %cst_41 {dimension_numbers = #tpu.dot_dimension_numbers<[1], [0], [0], [1], [0, 0, 1, 1], [], []>} : vector<16x72xf32>, vector<72x384xf32>, vector<16x384xf32> -> vector<16x384xf32>
    %94 = vector.broadcast %1 : vector<1x384xf32> to vector<16x384xf32>
    %95 = arith.mulf %93, %94 : vector<16x384xf32>
    %cst_42 = arith.constant dense<0.000000e+00> : vector<16xf32>
    %96 = vector.multi_reduction <add>, %95, %cst_42 [1] : vector<16x384xf32> to vector<16xf32>
    %97 = vector.shape_cast %96 : vector<16xf32> to vector<16x1xf32>
    %cst_43 = arith.constant 3.906250e-03 : f32
    %98 = vector.broadcast %cst_43 : f32 to vector<16x1xf32>
    %99 = arith.mulf %97, %98 : vector<16x1xf32>
    %100 = arith.mulf %95, %95 : vector<16x384xf32>
    %cst_44 = arith.constant dense<0.000000e+00> : vector<16xf32>
    %101 = vector.multi_reduction <add>, %100, %cst_44 [1] : vector<16x384xf32> to vector<16xf32>
    %102 = vector.shape_cast %101 : vector<16xf32> to vector<16x1xf32>
    %cst_45 = arith.constant 3.906250e-03 : f32
    %103 = vector.broadcast %cst_45 : f32 to vector<16x1xf32>
    %104 = arith.mulf %102, %103 : vector<16x1xf32>
    %105 = arith.mulf %99, %99 : vector<16x1xf32>
    %106 = arith.subf %104, %105 : vector<16x1xf32>
    %107 = vector.broadcast %99 : vector<16x1xf32> to vector<16x384xf32>
    %108 = arith.subf %93, %107 : vector<16x384xf32>
    %cst_46 = arith.constant 9.99999974E-6 : f32
    %109 = vector.broadcast %cst_46 : f32 to vector<16x1xf32>
    %110 = arith.addf %106, %109 : vector<16x1xf32>
    %111 = math.rsqrt %110 : vector<16x1xf32>
    %112 = vector.broadcast %111 : vector<16x1xf32> to vector<16x384xf32>
    %113 = arith.mulf %108, %112 : vector<16x384xf32>
    %cst_47 = arith.constant 0.000000e+00 : f32
    %114 = vector.broadcast %cst_47 : f32 to vector<16x384xf32>
    %115 = arith.cmpf oge, %113, %114 : vector<16x384xf32>
    %cst_48 = arith.constant 2.000000e-01 : f32
    %116 = vector.broadcast %cst_48 : f32 to vector<16x384xf32>
    %117 = arith.mulf %116, %113 : vector<16x384xf32>
    %118 = arith.select %115, %113, %117 : vector<16x384xi1>, vector<16x384xf32>
    %119 = vector.broadcast %1 : vector<1x384xf32> to vector<16x384xf32>
    %120 = arith.mulf %118, %119 : vector<16x384xf32>
    %c0_49 = arith.constant 0 : index
    %c0_50 = arith.constant 0 : index
    %121 = vector.load %arg10[%c0_49, %c0_50] : memref<16x144xf32, #tpu.memory_space<vmem>>, vector<16x144xf32>
    %122 = vector.extract_strided_slice %120 {offsets = [0, 365], sizes = [16, 19], strides = [1, 1]} : vector<16x384xf32> to vector<16x19xf32>
    %123 = vector.extract_strided_slice %120 {offsets = [0, 0], sizes = [16, 365], strides = [1, 1]} : vector<16x384xf32> to vector<16x365xf32>
    %124 = tpu.concatenate %122, %123 in 1 : vector<16x19xf32>, vector<16x365xf32> -> vector<16x384xf32>
    %125 = vector.extract_strided_slice %120 {offsets = [0, 366], sizes = [16, 18], strides = [1, 1]} : vector<16x384xf32> to vector<16x18xf32>
    %126 = vector.extract_strided_slice %120 {offsets = [0, 0], sizes = [16, 366], strides = [1, 1]} : vector<16x384xf32> to vector<16x366xf32>
    %127 = tpu.concatenate %125, %126 in 1 : vector<16x18xf32>, vector<16x366xf32> -> vector<16x384xf32>
    %128 = vector.extract_strided_slice %120 {offsets = [0, 367], sizes = [16, 17], strides = [1, 1]} : vector<16x384xf32> to vector<16x17xf32>
    %129 = vector.extract_strided_slice %120 {offsets = [0, 0], sizes = [16, 367], strides = [1, 1]} : vector<16x384xf32> to vector<16x367xf32>
    %130 = tpu.concatenate %128, %129 in 1 : vector<16x17xf32>, vector<16x367xf32> -> vector<16x384xf32>
    %131 = vector.extract_strided_slice %120 {offsets = [0, 383], sizes = [16, 1], strides = [1, 1]} : vector<16x384xf32> to vector<16x1xf32>
    %132 = vector.extract_strided_slice %120 {offsets = [0, 0], sizes = [16, 383], strides = [1, 1]} : vector<16x384xf32> to vector<16x383xf32>
    %133 = tpu.concatenate %131, %132 in 1 : vector<16x1xf32>, vector<16x383xf32> -> vector<16x384xf32>
    %134 = vector.extract_strided_slice %120 {offsets = [0, 1], sizes = [16, 383], strides = [1, 1]} : vector<16x384xf32> to vector<16x383xf32>
    %135 = vector.extract_strided_slice %120 {offsets = [0, 0], sizes = [16, 1], strides = [1, 1]} : vector<16x384xf32> to vector<16x1xf32>
    %136 = tpu.concatenate %134, %135 in 1 : vector<16x383xf32>, vector<16x1xf32> -> vector<16x384xf32>
    %137 = vector.extract_strided_slice %120 {offsets = [0, 17], sizes = [16, 367], strides = [1, 1]} : vector<16x384xf32> to vector<16x367xf32>
    %138 = vector.extract_strided_slice %120 {offsets = [0, 0], sizes = [16, 17], strides = [1, 1]} : vector<16x384xf32> to vector<16x17xf32>
    %139 = tpu.concatenate %137, %138 in 1 : vector<16x367xf32>, vector<16x17xf32> -> vector<16x384xf32>
    %140 = vector.extract_strided_slice %120 {offsets = [0, 18], sizes = [16, 366], strides = [1, 1]} : vector<16x384xf32> to vector<16x366xf32>
    %141 = vector.extract_strided_slice %120 {offsets = [0, 0], sizes = [16, 18], strides = [1, 1]} : vector<16x384xf32> to vector<16x18xf32>
    %142 = tpu.concatenate %140, %141 in 1 : vector<16x366xf32>, vector<16x18xf32> -> vector<16x384xf32>
    %143 = vector.extract_strided_slice %120 {offsets = [0, 19], sizes = [16, 365], strides = [1, 1]} : vector<16x384xf32> to vector<16x365xf32>
    %144 = vector.extract_strided_slice %120 {offsets = [0, 0], sizes = [16, 19], strides = [1, 1]} : vector<16x384xf32> to vector<16x19xf32>
    %145 = tpu.concatenate %143, %144 in 1 : vector<16x365xf32>, vector<16x19xf32> -> vector<16x384xf32>
    %146 = tpu.concatenate %124, %127, %130, %133, %120, %136, %139, %142, %145 in 0 : vector<16x384xf32>, vector<16x384xf32>, vector<16x384xf32>, vector<16x384xf32>, vector<16x384xf32>, vector<16x384xf32>, vector<16x384xf32>, vector<16x384xf32>, vector<16x384xf32> -> vector<144x384xf32>
    %cst_51 = arith.constant dense<0.000000e+00> : vector<16x384xf32>
    %147 = tpu.matmul %121, %146, %cst_51 {dimension_numbers = #tpu.dot_dimension_numbers<[1], [0], [0], [1], [0, 0, 1, 1], [], []>} : vector<16x144xf32>, vector<144x384xf32>, vector<16x384xf32> -> vector<16x384xf32>
    %148 = vector.broadcast %1 : vector<1x384xf32> to vector<16x384xf32>
    %149 = arith.mulf %147, %148 : vector<16x384xf32>
    %cst_52 = arith.constant dense<0.000000e+00> : vector<16xf32>
    %150 = vector.multi_reduction <add>, %149, %cst_52 [1] : vector<16x384xf32> to vector<16xf32>
    %151 = vector.shape_cast %150 : vector<16xf32> to vector<16x1xf32>
    %cst_53 = arith.constant 3.906250e-03 : f32
    %152 = vector.broadcast %cst_53 : f32 to vector<16x1xf32>
    %153 = arith.mulf %151, %152 : vector<16x1xf32>
    %154 = arith.mulf %149, %149 : vector<16x384xf32>
    %cst_54 = arith.constant dense<0.000000e+00> : vector<16xf32>
    %155 = vector.multi_reduction <add>, %154, %cst_54 [1] : vector<16x384xf32> to vector<16xf32>
    %156 = vector.shape_cast %155 : vector<16xf32> to vector<16x1xf32>
    %cst_55 = arith.constant 3.906250e-03 : f32
    %157 = vector.broadcast %cst_55 : f32 to vector<16x1xf32>
    %158 = arith.mulf %156, %157 : vector<16x1xf32>
    %159 = arith.mulf %153, %153 : vector<16x1xf32>
    %160 = arith.subf %158, %159 : vector<16x1xf32>
    %161 = vector.broadcast %153 : vector<16x1xf32> to vector<16x384xf32>
    %162 = arith.subf %147, %161 : vector<16x384xf32>
    %cst_56 = arith.constant 9.99999974E-6 : f32
    %163 = vector.broadcast %cst_56 : f32 to vector<16x1xf32>
    %164 = arith.addf %160, %163 : vector<16x1xf32>
    %165 = math.rsqrt %164 : vector<16x1xf32>
    %166 = vector.broadcast %165 : vector<16x1xf32> to vector<16x384xf32>
    %167 = arith.mulf %162, %166 : vector<16x384xf32>
    %168 = arith.addf %66, %167 : vector<16x384xf32>
    %cst_57 = arith.constant 0.000000e+00 : f32
    %169 = vector.broadcast %cst_57 : f32 to vector<16x384xf32>
    %170 = arith.cmpf oge, %168, %169 : vector<16x384xf32>
    %cst_58 = arith.constant 2.000000e-01 : f32
    %171 = vector.broadcast %cst_58 : f32 to vector<16x384xf32>
    %172 = arith.mulf %171, %168 : vector<16x384xf32>
    %173 = arith.select %170, %168, %172 : vector<16x384xi1>, vector<16x384xf32>
    %c0_59 = arith.constant 0 : index
    %c0_60 = arith.constant 0 : index
    %174 = vector.load %arg6[%c0_59, %c0_60] : memref<384x256xf32, #tpu.memory_space<vmem>>, vector<384x256xf32>
    %cst_61 = arith.constant dense<0.000000e+00> : vector<16x256xf32>
    %175 = tpu.matmul %173, %174, %cst_61 {dimension_numbers = #tpu.dot_dimension_numbers<[1], [0], [0], [1], [0, 0, 1, 1], [], []>} : vector<16x384xf32>, vector<384x256xf32>, vector<16x256xf32> -> vector<16x256xf32>
    %c0_62 = arith.constant 0 : index
    %c0_63 = arith.constant 0 : index
    %c0_64 = arith.constant 0 : index
    %176 = vector.load %arg11[%c0_62, %c0_63, %c0_64] : memref<1x16x256xf32, #tpu.memory_space<vmem>>, vector<1x16x256xf32>
    %177 = vector.shape_cast %176 : vector<1x16x256xf32> to vector<16x256xf32>
    %178 = vector.shape_cast %175 : vector<16x256xf32> to vector<1x16x256xf32>
    tpu.vector_store %arg11[%c0_62, %c0_63, %c0_64], %178 {strides = array<i32>} : memref<1x16x256xf32, #tpu.memory_space<vmem>>, vector<1x16x256xf32>,
    return
  }
  func.func @transform_0(%arg0: i32) -> (i32, i32, i32) {
    %c0_i32 = arith.constant 0 : i32
    %c0_i32_0 = arith.constant 0 : i32
    %c0_i32_1 = arith.constant 0 : i32
    return %arg0, %c0_i32, %c0_i32_0 : i32, i32, i32
  }
  func.func @transform_1(%arg0: i32) -> (i32, i32, i32) {
    %c0_i32 = arith.constant 0 : i32
    %c0_i32_0 = arith.constant 0 : i32
    %c0_i32_1 = arith.constant 0 : i32
    return %arg0, %c0_i32, %c0_i32_0 : i32, i32, i32
  }
  func.func @transform_2(%arg0: i32) -> (i32, i32) {
    %c0_i32 = arith.constant 0 : i32
    %c0_i32_0 = arith.constant 0 : i32
    %c0_i32_1 = arith.constant 0 : i32
    return %c0_i32, %c0_i32_0 : i32, i32
  }
  func.func @transform_3(%arg0: i32) -> (i32, i32, i32) {
    %c0_i32 = arith.constant 0 : i32
    %c0_i32_0 = arith.constant 0 : i32
    %c0_i32_1 = arith.constant 0 : i32
    %c0_i32_2 = arith.constant 0 : i32
    return %c0_i32, %c0_i32_0, %c0_i32_1 : i32, i32, i32
  }
  func.func @transform_4(%arg0: i32) -> (i32, i32) {
    %c0_i32 = arith.constant 0 : i32
    %c0_i32_0 = arith.constant 0 : i32
    %c0_i32_1 = arith.constant 0 : i32
    return %c0_i32, %c0_i32_0 : i32, i32
  }
  func.func @transform_5(%arg0: i32) -> (i32, i32) {
    %c0_i32 = arith.constant 0 : i32
    %c0_i32_0 = arith.constant 0 : i32
    %c0_i32_1 = arith.constant 0 : i32
    return %c0_i32, %c0_i32_0 : i32, i32
  }
  func.func @transform_6(%arg0: i32) -> (i32, i32) {
    %c0_i32 = arith.constant 0 : i32
    %c0_i32_0 = arith.constant 0 : i32
    %c0_i32_1 = arith.constant 0 : i32
    return %c0_i32, %c0_i32_0 : i32, i32
  }
  func.func @transform_7(%arg0: i32) -> (i32, i32) {
    %c0_i32 = arith.constant 0 : i32
    %c0_i32_0 = arith.constant 0 : i32
    %c0_i32_1 = arith.constant 0 : i32
    return %c0_i32, %c0_i32_0 : i32, i32
  }
  func.func @transform_8(%arg0: i32) -> (i32, i32) {
    %c0_i32 = arith.constant 0 : i32
    %c0_i32_0 = arith.constant 0 : i32
    %c0_i32_1 = arith.constant 0 : i32
    return %c0_i32, %c0_i32_0 : i32, i32
  }
  func.func @transform_9(%arg0: i32) -> (i32, i32) {
    %c0_i32 = arith.constant 0 : i32
    %c0_i32_0 = arith.constant 0 : i32
    %c0_i32_1 = arith.constant 0 : i32
    return %c0_i32, %c0_i32_0 : i32, i32
  }
  func.func @transform_10(%arg0: i32) -> (i32, i32, i32) {
    %c0_i32 = arith.constant 0 : i32
    %c0_i32_0 = arith.constant 0 : i32
    %c0_i32_1 = arith.constant 0 : i32
    return %arg0, %c0_i32, %c0_i32_0 : i32, i32, i32
  }
}

</mosaic_0001>

<bundles_post_ra>
// kernel: up_forward.1
= control target key start
LH: loop header
LB: loop body
LE: loop exit
PB: predicated region body
PF: predicated region fallthrough
CT: control target
= control target key end

     0   :  { %15 = vsyncpa [#allocation3], 0  ;;  %s3462_s0 = inlined_call_operand.vmem [shape: f32[2,4,64], index: 0, kind: input, shape index: {}]   ;;  %s3463_s1 = inlined_call_operand.vmem [shape: f32[2,4,256], index: 1, kind: input, shape index: {}]   ;;  %s3464_s2 = inlined_call_operand.vmem [shape: f32[4,16], index: 2, kind: input, shape index: {}]   ;;  %s3465_s3 = inlined_call_operand.hbm [shape: f32[4,64,384], index: 3, kind: input, shape index: {}]   ;;  %s3466_s4 = inlined_call_operand.hbm [shape: f32[256,384], index: 4, kind: input, shape index: {}]   ;;  %s3467_s5 = inlined_call_operand.hbm [shape: f32[384,256], index: 5, kind: input, shape index: {}]   ;;  %s3468_s6 = inlined_call_operand.vmem [shape: f32[2,384], index: 6, kind: input, shape index: {}]   ;;  %s3469_s7 = inlined_call_operand.vmem [shape: f32[16,8], index: 7, kind: input, shape index: {}]   ;;  %s3470_s8 = inlined_call_operand.vmem [shape: f32[16,72], index: 8, kind: input, shape index: {}]   ;;  %s3471_s9 = inlined_call_operand.vmem [shape: f32[16,144], index: 9, kind: input, shape index: {}]   ;;  %s3472_s10 = inlined_call_operand.vmem [shape: f32[2,16,256], index: 10, kind: output, shape index: {}]  }
   0x1   :  { %16 = vsyncpa [#allocation5], 0  ;;  %s2835_s13 = smov 0  }
   0x2 LB: > { %s2841_s14 = sadd.s32 4294967295, %s2763_s13   ;;  %p2383_p0 = scmp.ge.s32.totalorder %s2763_s13, 1  ;;  %s2763_s13 = sphi %s2835_s13, %s22_s13  }
   0x3   : > { %p273_p1 = scmp.lt.s32.totalorder %s2763_s13, 3  ;;  %p2456_p2 = scmp.eq.s32.totalorder %s2841_s14, 0 }
   0x4   : > { %s301_s17 = sshll.u32 %s3466_s4, 4  ;;  %s287_s21 = sshll.u32 %s3465_s3, 4  ;;  %s302_s17 = int_to_ptr.hbm [resolvable:$true] %s301_s17  ;;  %s288_s21 = int_to_ptr.hbm [resolvable:$true] %s287_s21 }
   0x5   : > { %p2849_p3 = pnand %p2383_p0, %p273_p1  ;;  %s2765_s22 = smov [#allocation4]  }
   0x6   : > { %s303_s23 = sshll.u32 %s2765_s22, 4  ;;  %s2766_s25 = smov [#allocation2]   ;;  %s304_s23 = int_to_ptr.vmem [resolvable:$true] %s303_s23 }
   0x7   : > { %p2446_p4 = pneg %p2849_p3  ;;  %s289_s26 = sshll.u32 %s2766_s25, 4  ;;  %s290_s26 = int_to_ptr.vmem [resolvable:$true] %s289_s26 }
   0x8   : > { %s315_s29 = sshll.u32 %s3467_s5, 4  ;;  %s2767_s30 = smov 384   ;;  %s316_s29 = int_to_ptr.hbm [resolvable:$true] %s315_s29 }
   0x9   : > { %p2860_p5 = pnand %p2456_p2, %p2446_p4  ;;  %s2768_s11 = smov 24  }
   0xa   : > { %s2769_s12 = smov [#allocation6]   ;;  %s2770_s16 = smov 256  }
   0xb   : > { %2452 = dma.hbm_to_vmem [thread:$0]  (!%p2860_p5), %s302_s17, 12288, %s304_s23, [#allocation5], %s2767_s30, %s2767_s30, %s2768_s11  }
   0xc   : > { %2449 = dma.hbm_to_vmem [thread:$0]  (!%p2860_p5), %s288_s21, 12288, %s290_s26, [#allocation3], %s2767_s30, %s2767_s30, %s2768_s11  }
   0xd   : > { %s317_s15 = sshll.u32 %s2769_s12, 4  ;;  %s2771_s19 = smov 16   ;;  %s318_s15 = int_to_ptr.vmem [resolvable:$true] %s317_s15 }
   0xe   : > { %2455 = dma.hbm_to_vmem [thread:$0]  (!%p2860_p5), %s316_s29, 12288, %s318_s15, [#allocation5], %s2770_s16, %s2770_s16, %s2771_s19  }
   0xf   : > { %360 = sbr.rel (%p2849_p3) target bundleno = 1616 (0x650), region = 60 }
  0x14   : > { %2754 = dma.done.wait (%p2456_p2), [#allocation3], 12288  }
  0x15   : > { %2756 = vsyncadd (%p2456_p2), [#allocation3], 4294955008 }
  0x16   : > { %2758 = dma.done.wait (%p2456_p2), [#allocation5], 24576  }
  0x17   : > { %2760 = vsyncadd (%p2456_p2), [#allocation5], 4294942720  ;;  %v450_v0 = vld [vmem:[#allocation2 + $0xa8] sm:$0xff]  ;;  %v452_v1 = vld [vmem:[#allocation2 + $0xb8] sm:$0xff]  ;;  %p413_p6 = scmp.lt.s32.totalorder %s2841_s14, 1  ;;  %vm453_vm0 = vcmask 523264  }
  0x18   : > { %v539_v2 = vld [vmem:[#allocation2 + $0x168] sm:$0xff]  ;;  %465 = vmatpush.msra.mxu1 %v450_v0  ;;  %505 = vmatpush.msra.mxu2 %v452_v1  ;;  %v447_v3 = vld [vmem:[#allocation2 + $0x90] sm:$0xff]  ;;  %v449_v4 = vld [vmem:[#allocation2 + $0xa0] sm:$0xff]  ;;  %vm790_vm1 = vcmask 1043456   ;;  %vm798_vm2 = vcmask 130048   ;;  %s2772_s30 = smov 110  }
  0x19   : > { %v536_v5 = vld [vmem:[#allocation2 + $0x150] sm:$0xff]  ;;  %550 = vmatpush.msra.mxu3 %v539_v2  ;;  %v444_v6 = vld [vmem:[#allocation2 + $0x78] sm:$0xff]  ;;  %v446_v7 = vld [vmem:[#allocation2 + $0x88] sm:$0xff]  ;;  %s3483_s14 = smov (!%p413_p6, %s2841_s14), 1  ;;  %s2773_s11 = smov 109   ;;  %vm1153_vm6 = vcmask 64512  }
  0x1a   : > { %466 = vmatpush.msra.mxu1 %v447_v3  ;;  %506 = vmatpush.msra.mxu2 %v449_v4  ;;  %v533_v8 = vld [vmem:[#allocation2 + $0x138] sm:$0xff]  ;;  %v441_v9 = vld [vmem:[#allocation2 + $0x60] sm:$0xff]  ;;  %v443_v10 = vld [vmem:[#allocation2 + $0x70] sm:$0xff]  ;;  %s2392_s17 = sshll.u32 %s3483_s14, 2  ;;  %s2432_s24 = sshll.u32 %s3483_s14, 3  ;;  %vm1402_vm7 = vcmask 891904  }
  0x1b   : > { %551 = vmatpush.msra.mxu3 %v536_v5  ;;  %v530_v11 = vld [vmem:[#allocation2 + $0x120] sm:$0xff]  ;;  %v438_v12 = vld [vmem:[#allocation2 + $0x48] sm:$0xff]  ;;  %v440_v13 = vld [vmem:[#allocation2 + $0x58] sm:$0xff]  ;;  %s416_s21 = scalar_lea.vmem %s3462_s0, %s2392_s17  ;;  %s421_s27 = scalar_lea.vmem %s3463_s1, %s2432_s24  ;;  %vm1388_vm8 = vcmask 900096   ;;  %vm1374_vm9 = vcmask 908288   ;;  %vm1360_vm10 = vcmask 1039360  }
  0x1c   : > { %467 = vmatpush.msra.mxu1 %v444_v6  ;;  %507 = vmatpush.msra.mxu2 %v446_v7  ;;  %v527_v14 = vld [vmem:[#allocation2 + $0x108] sm:$0xff]  ;;  %v435_v15 = vld [vmem:[#allocation2 + $0x30] sm:$0xff]  ;;  %v437_v16 = vld [vmem:[#allocation2 + $0x40] sm:$0xff]  ;;  %s2774_s12 = smov 18   ;;  %s2775_s15 = smov 111   ;;  %vm1347_vm11 = vcmask 7168  }
  0x1d   : > { %552 = vmatpush.msra.mxu3 %v533_v8  ;;  %v524_v17 = vld [vmem:[#allocation2 + $0xf0] sm:$0xff]  ;;  %v432_v18 = vld [vmem:[#allocation2 + $0x18] sm:$0xff]  ;;  %v434_v19 = vld [vmem:[#allocation2 + $0x28] sm:$0xff]  ;;  %s2776_s16 = smov 127   ;;  %s2777_s19 = smov 1   ;;  %vm1333_vm12 = vcmask 138240  }
  0x1e   : > { %468 = vmatpush.msra.mxu1 %v441_v9  ;;  %508 = vmatpush.msra.mxu2 %v443_v10  ;;  %v521_v20 = vld [vmem:[#allocation2 + $0xd8] sm:$0xff]  ;;  %v429_v21 = vld [vmem:[#allocation2] sm:$0xff]  ;;  %v431_v22 = vld [vmem:[#allocation2 + $0x10] sm:$0xff]  ;;  %s2778_s17 = smov 17   ;;  %s2779_s18 = smov 19   ;;  %vm1319_vm13 = vcmask 146432  }
  0x1f   : > { %553 = vmatpush.msra.mxu3 %v530_v11  ;;  %v540_v23 = vld [vmem:[#allocation2 + $0x170] sm:$0xff]  ;;  %v518_v24 = vld [vmem:[#allocation2 + $0xc0] sm:$0xff]  ;;  %v624_v26 = vld [vmem:[#allocation2 + $0x228] sm:$0xff]  ;;  %vm3473_vm14 = vcmask 154624   ;;  %vm1410_vm15 = vcmask 588800  }
  0x20   : > { %469 = vmatpush.msra.mxu1 %v438_v12  ;;  %509 = vmatpush.msra.mxu2 %v440_v13  ;;  %v451_v25 = vld [vmem:[#allocation2 + $0xb0] sm:$0xff]  ;;  %v448_v28 = vld [vmem:[#allocation2 + $0x98] sm:$0xff]  ;;  %v445_v32 = vld [vmem:[#allocation2 + $0x80] sm:$0xff] }
  0x21   : > { %554 = vmatpush.msra.mxu3 %v527_v14  ;;  %v625_v27 = vld [vmem:[#allocation2 + $0x230] sm:$0xff]  ;;  %570 = vmatpush.msra.mxu0 %v540_v23  ;;  %v2891_v29 = vld [vmem:[%s416_s21] sm:$0xf]  ;;  %v619_v35 = vld [vmem:[#allocation2 + $0x200] sm:$0xff] }
  0x22   : > { %470 = vmatpush.msra.mxu1 %v435_v15  ;;  %510 = vmatpush.msra.mxu2 %v437_v16  ;;  %v621_v30 = vld [vmem:[#allocation2 + $0x210] sm:$0xff]  ;;  %v622_v31 = vld [vmem:[#allocation2 + $0x218] sm:$0xff]  ;;  %v442_v36 = vld [vmem:[#allocation2 + $0x68] sm:$0xff] }
  0x23   : > { %555 = vmatpush.msra.mxu3 %v524_v17  ;;  %v537_v33 = vld [vmem:[#allocation2 + $0x158] sm:$0xff]  ;;  %v534_v37 = vld [vmem:[#allocation2 + $0x140] sm:$0xff]  ;;  %v616_v39 = vld [vmem:[#allocation2 + $0x1e8] sm:$0xff] }
  0x24   : > { %471 = vmatpush.msra.mxu1 %v432_v18  ;;  %511 = vmatpush.msra.mxu2 %v434_v19  ;;  %v618_v34 = vld [vmem:[#allocation2 + $0x1f8] sm:$0xff]  ;;  %v615_v38 = vld [vmem:[#allocation2 + $0x1e0] sm:$0xff]  ;;  %v439_v40 = vld [vmem:[#allocation2 + $0x50] sm:$0xff] }
  0x25   : > { %556 = vmatpush.msra.mxu3 %v521_v20  ;;  %571 = vmatpush.msra.mxu0 %v537_v33  ;;  %v612_v41 = vld [vmem:[#allocation2 + $0x1c8] sm:$0xff]  ;;  %v613_v42 = vld [vmem:[#allocation2 + $0x1d0] sm:$0xff]  ;;  %v436_v43 = vld [vmem:[#allocation2 + $0x38] sm:$0xff] }
  0x26   : > { %472 = vmatpush.msra.mxu1 %v429_v21  ;;  %512 = vmatpush.msra.mxu2 %v431_v22  ;;  %v531_v44 = vld [vmem:[#allocation2 + $0x128] sm:$0xff]  ;;  %v609_v45 = vld [vmem:[#allocation2 + $0x1b0] sm:$0xff]  ;;  %v610_v46 = vld [vmem:[#allocation2 + $0x1b8] sm:$0xff] }
  0x27   : > { %557 = vmatpush.msra.mxu3 %v518_v24  ;;  %572 = vmatpush.msra.mxu0 %v534_v37  ;;  %v433_v47 = vld [vmem:[#allocation2 + $0x20] sm:$0xff]  ;;  %v528_v48 = vld [vmem:[#allocation2 + $0x110] sm:$0xff]  ;;  %v606_v49 = vld [vmem:[#allocation2 + $0x198] sm:$0xff] }
  0x28   : > { %485 = vmatpush.msrb.mxu1 %v451_v25  ;;  %635 = vmatpush.msrb.mxu2 %v624_v26  ;;  %v607_v50 = vld [vmem:[#allocation2 + $0x1a0] sm:$0xff]  ;;  %v525_v51 = vld [vmem:[#allocation2 + $0xf8] sm:$0xff]  ;;  %v430_v52 = vld [vmem:[#allocation2 + $0x8] sm:$0xff] }
  0x29   : > { %655 = vmatpush.msrb.mxu3 %v625_v27  ;;  %2399 = vmatmul.msk.f32.vlgmr.msra.gmra.mxu2 %vm453_vm0, %v2891_v29  ;;  %v603_v53 = vld [vmem:[#allocation2 + $0x180] sm:$0xff]  ;;  %v604_v54 = vld [vmem:[#allocation2 + $0x188] sm:$0xff]  ;;  %v541_v55 = vld [vmem:[#allocation2 + $0x178] sm:$0xff] }
  0x2a   : > { %486 = vmatpush.msrb.mxu1 %v448_v28  ;;  %2400 = vmatmul.msk.f32.vlgmr.msra.gmra.mxu3 %vm453_vm0, %v2891_v29  ;;  %v710_v56 = vld [vmem:[#allocation2 + $0x2f0] sm:$0xff]  ;;  %v711_v57 = vld [vmem:[#allocation2 + $0x2f8] sm:$0xff]  ;;  %v538_v58 = vld [vmem:[#allocation2 + $0x160] sm:$0xff] }
  0x2b   : > { %636 = vmatpush.msrb.mxu2 %v621_v30  ;;  %656 = vmatpush.msrb.mxu3 %v622_v31  ;;  %v522_v59 = vld [vmem:[#allocation2 + $0xe0] sm:$0xff]  ;;  %v707_v60 = vld [vmem:[#allocation2 + $0x2d8] sm:$0xff]  ;;  %v535_v62 = vld [vmem:[#allocation2 + $0x148] sm:$0xff] }
  0x2c   : > { %487 = vmatpush.msrb.mxu1 %v445_v32  ;;  %573 = vmatpush.msra.mxu0 %v531_v44  ;;  %v708_v61 = vld [vmem:[#allocation2 + $0x2e0] sm:$0xff]  ;;  %v519_v63 = vld [vmem:[#allocation2 + $0xc8] sm:$0xff]  ;;  %v532_v2 = vld [vmem:[#allocation2 + $0x130] sm:$0xff] }
  0x2d   : > { %637 = vmatpush.msrb.mxu2 %v618_v34  ;;  %657 = vmatpush.msrb.mxu3 %v619_v35  ;;  %v704_v0 = vld [vmem:[#allocation2 + $0x2c0] sm:$0xff]  ;;  %v705_v1 = vld [vmem:[#allocation2 + $0x2c8] sm:$0xff]  ;;  %v702_v4 = vld [vmem:[#allocation2 + $0x2b0] sm:$0xff] }
  0x2e   : > { %488 = vmatpush.msrb.mxu1 %v442_v36  ;;  %574 = vmatpush.msra.mxu0 %v528_v48  ;;  %v701_v3 = vld [vmem:[#allocation2 + $0x2a8] sm:$0xff]  ;;  %v529_v5 = vld [vmem:[#allocation2 + $0x118] sm:$0xff]  ;;  %v698_v7 = vld [vmem:[#allocation2 + $0x290] sm:$0xff] }
  0x2f   : > { %638 = vmatpush.msrb.mxu2 %v615_v38  ;;  %658 = vmatpush.msrb.mxu3 %v616_v39  ;;  %v626_v6 = vld [vmem:[#allocation2 + $0x238] sm:$0xff]  ;;  %v526_v9 = vld [vmem:[#allocation2 + $0x100] sm:$0xff]  ;;  %v523_v13 = vld [vmem:[#allocation2 + $0xe8] sm:$0xff] }
  0x30   : > { %489 = vmatpush.msrb.mxu1 %v439_v40  ;;  %575 = vmatpush.msra.mxu0 %v525_v51  ;;  %v699_v8 = vld [vmem:[#allocation2 + $0x298] sm:$0xff]  ;;  %v623_v10 = vld [vmem:[#allocation2 + $0x220] sm:$0xff]  ;;  %v620_v14 = vld [vmem:[#allocation2 + $0x208] sm:$0xff] }
  0x31   : > { %639 = vmatpush.msrb.mxu2 %v612_v41  ;;  %659 = vmatpush.msrb.mxu3 %v613_v42  ;;  %v695_v11 = vld [vmem:[#allocation2 + $0x278] sm:$0xff]  ;;  %v696_v12 = vld [vmem:[#allocation2 + $0x280] sm:$0xff]  ;;  %v693_v16 = vld [vmem:[#allocation2 + $0x268] sm:$0xff] }
  0x32   : > { %490 = vmatpush.msrb.mxu1 %v436_v43  ;;  %576 = vmatpush.msra.mxu0 %v522_v59  ;;  %v692_v15 = vld [vmem:[#allocation2 + $0x260] sm:$0xff]  ;;  %v520_v17 = vld [vmem:[#allocation2 + $0xd0] sm:$0xff]  ;;  %v689_v19 = vld [vmem:[#allocation2 + $0x248] sm:$0xff] }
  0x33   : > { %640 = vmatpush.msrb.mxu2 %v609_v45  ;;  %660 = vmatpush.msrb.mxu3 %v610_v46  ;;  %v617_v18 = vld [vmem:[#allocation2 + $0x1f0] sm:$0xff]  ;;  %v709_v21 = vld [vmem:[#allocation2 + $0x2e8] sm:$0xff]  ;;  %v614_v22 = vld [vmem:[#allocation2 + $0x1d8] sm:$0xff] }
  0x34   : > { %491 = vmatpush.msrb.mxu1 %v433_v47  ;;  %577 = vmatpush.msra.mxu0 %v519_v63  ;;  %v690_v20 = vld [vmem:[#allocation2 + $0x250] sm:$0xff]  ;;  %v611_v24 = vld [vmem:[#allocation2 + $0x1c0] sm:$0xff]  ;;  %v703_v25 = vld [vmem:[#allocation2 + $0x2b8] sm:$0xff] }
  0x35   : > { %641 = vmatpush.msrb.mxu2 %v606_v49  ;;  %661 = vmatpush.msrb.mxu3 %v607_v50  ;;  %v706_v23 = vld [vmem:[#allocation2 + $0x2d0] sm:$0xff]  ;;  %v608_v26 = vld [vmem:[#allocation2 + $0x1a8] sm:$0xff]  ;;  %v700_v27 = vld [vmem:[#allocation2 + $0x2a0] sm:$0xff] }
  0x36   : > { %2397 = vmatmul.msk.f32.vlgmr.msra.gmra.mxu1 %vm453_vm0, %v2891_v29  ;;  %675 = vmatpush.msrb.mxu0 %v626_v6  ;;  %v605_v28 = vld [vmem:[#allocation2 + $0x190] sm:$0xff]  ;;  %v697_v30 = vld [vmem:[#allocation2 + $0x288] sm:$0xff]  ;;  %v691_v32 = vld [vmem:[#allocation2 + $0x258] sm:$0xff] }
  0x37   : > { %492 = vmatpush.msrb.mxu1 %v430_v52  ;;  %642 = vmatpush.msrb.mxu2 %v603_v53  ;;  %v694_v31 = vld [vmem:[#allocation2 + $0x270] sm:$0xff]  ;;  %v688_v33 = vld [vmem:[#allocation2 + $0x240] sm:$0xff]  ;;  %v797_v50 = vld [vmem:[%s3464_s2] sm:$0xf] }
  0x38   : > { %662 = vmatpush.msrb.mxu3 %v604_v54  ;;  %2403 = vmatmul.msk.f32.vlgmr.msrb.gmra.mxu2 %vm453_vm0, %v2891_v29  ;;  %v962_v52 = vld [vmem:[#allocation4 + $0x168] sm:$0xff]  ;;  %v959_v54 = vld [vmem:[#allocation4 + $0x150] sm:$0xff]  ;;  %v941_v6 = vld [vmem:[#allocation4 + $0xc0] sm:$0xff] }
  0x39   : > { %590 = vmatpush.msra.mxu1 %v541_v55  ;;  %740 = vmatpush.msra.mxu2 %v710_v56  ;;  %v956_v56 = vld [vmem:[#allocation4 + $0x138] sm:$0xff]  ;;  %v950_v63 = vld [vmem:[#allocation4 + $0x108] sm:$0xff] }
  0x3a   : > { %760 = vmatpush.msra.mxu3 %v711_v57  ;;  %676 = vmatpush.msrb.mxu0 %v623_v10  ;;  %v1011_v57 = vld [vmem:[#allocation4 + $0x2f0] sm:$0xff] }
  0x3b   : > { %591 = vmatpush.msra.mxu1 %v538_v58  ;;  %741 = vmatpush.msra.mxu2 %v707_v60  ;;  %v953_v60 = vld [vmem:[#allocation4 + $0x120] sm:$0xff]  ;;  %v935_v10 = vld [vmem:[#allocation4 + $0x90] sm:$0xff] }
  0x3c   : > { %761 = vmatpush.msra.mxu3 %v708_v61  ;;  %2401 = vmatmul.msk.f32.vlgmr.msra.gmra.mxu0 %vm453_vm0, %v2891_v29  ;;  %v1008_v61 = vld [vmem:[#allocation4 + $0x2d8] sm:$0xff] }
  0x3d   : > { %592 = vmatpush.msra.mxu1 %v535_v62  ;;  %742 = vmatpush.msra.mxu2 %v704_v0 }
  0x3e   : > { %762 = vmatpush.msra.mxu3 %v705_v1  ;;  %2398 = vmatmul.msk.f32.vlgmr.msrb.gmra.mxu1 %vm453_vm0, %v2891_v29  ;;  %v1010_v1 = vld [vmem:[#allocation4 + $0x2e8] sm:$0xff] }
  0x3f   : > { %593 = vmatpush.msra.mxu1 %v532_v2  ;;  %743 = vmatpush.msra.mxu2 %v701_v3  ;;  %v947_v2 = vld [vmem:[#allocation4 + $0xf0] sm:$0xff] }
  0x40   : > { %763 = vmatpush.msra.mxu3 %v702_v4  ;;  %677 = vmatpush.msrb.mxu0 %v620_v14  ;;  %v1007_v3 = vld [vmem:[#allocation4 + $0x2d0] sm:$0xff]  ;;  %v944_v4 = vld [vmem:[#allocation4 + $0xd8] sm:$0xff]  ;;  %v929_v14 = vld [vmem:[#allocation4 + $0x60] sm:$0xff] }
  0x41   : > { %2404 = vmatmul.msk.f32.vlgmr.msrb.gmra.mxu3 %vm453_vm0, %v2891_v29  ;;  %594 = vmatpush.msra.mxu1 %v529_v5  ;;  %v1004_v5 = vld [vmem:[#allocation4 + $0x2b8] sm:$0xff] }
  0x42   : > { %744 = vmatpush.msra.mxu2 %v698_v7  ;;  %764 = vmatpush.msra.mxu3 %v699_v8  ;;  %v1001_v7 = vld [vmem:[#allocation4 + $0x2a0] sm:$0xff]  ;;  %v938_v8 = vld [vmem:[#allocation4 + $0xa8] sm:$0xff] }
  0x43   : > { %595 = vmatpush.msra.mxu1 %v526_v9  ;;  %678 = vmatpush.msrb.mxu0 %v617_v18  ;;  %v998_v9 = vld [vmem:[#allocation4 + $0x288] sm:$0xff]  ;;  %v923_v18 = vld [vmem:[#allocation4 + $0x30] sm:$0xff] }
  0x44   : > { %745 = vmatpush.msra.mxu2 %v695_v11  ;;  %765 = vmatpush.msra.mxu3 %v696_v12  ;;  %v995_v11 = vld [vmem:[#allocation4 + $0x270] sm:$0xff]  ;;  %v932_v12 = vld [vmem:[#allocation4 + $0x78] sm:$0xff] }
  0x45   : > { %596 = vmatpush.msra.mxu1 %v523_v13  ;;  %679 = vmatpush.msrb.mxu0 %v614_v22  ;;  %v992_v13 = vld [vmem:[#allocation4 + $0x258] sm:$0xff]  ;;  %v917_v22 = vld [vmem:[#allocation4] sm:$0xff] }
  0x46   : > { %746 = vmatpush.msra.mxu2 %v692_v15  ;;  %766 = vmatpush.msra.mxu3 %v693_v16  ;;  %v989_v15 = vld [vmem:[#allocation4 + $0x240] sm:$0xff]  ;;  %v926_v16 = vld [vmem:[#allocation4 + $0x48] sm:$0xff] }
  0x47   : > { %597 = vmatpush.msra.mxu1 %v520_v17  ;;  %680 = vmatpush.msrb.mxu0 %v611_v24  ;;  %v986_v17 = vld [vmem:[#allocation4 + $0x228] sm:$0xff]  ;;  %v964_v24 = vld [vmem:[#allocation4 + $0x178] sm:$0xff] }
  0x48   : > { %747 = vmatpush.msra.mxu2 %v689_v19  ;;  %767 = vmatpush.msra.mxu3 %v690_v20  ;;  %v983_v19 = vld [vmem:[#allocation4 + $0x210] sm:$0xff]  ;;  %v920_v20 = vld [vmem:[#allocation4 + $0x18] sm:$0xff] }
  0x49   : > { %2402 = vmatmul.msk.f32.vlgmr.msra.gmra.mxu1 %vm453_vm0, %v2891_v29  ;;  %2407 = vmatmul.msk.f32.vlgmr.msra.gmra.mxu2 %vm453_vm0, %v2891_v29 }
  0x4a   : > { %720 = vmatpush.msrb.mxu1 %v709_v21  ;;  %2408 = vmatmul.msk.f32.vlgmr.msra.gmra.mxu3 %vm453_vm0, %v2891_v29  ;;  %v980_v21 = vld [vmem:[#allocation4 + $0x1f8] sm:$0xff] }
  0x4b   : > { %681 = vmatpush.msrb.mxu0 %v608_v26  ;;  %v961_v26 = vld [vmem:[#allocation4 + $0x160] sm:$0xff] }
  0x4c   : > { %721 = vmatpush.msrb.mxu1 %v706_v23  ;;  %v977_v23 = vld [vmem:[#allocation4 + $0x1e0] sm:$0xff] }
  0x4d   : > { %682 = vmatpush.msrb.mxu0 %v605_v28  ;;  %v968_v28 = vld [vmem:[#allocation4 + $0x198] sm:$0xff] }
  0x4e   : > { %722 = vmatpush.msrb.mxu1 %v703_v25  ;;  %2405 = vmatmul.msk.f32.vlgmr.msrb.gmra.mxu0 %vm453_vm0, %v2891_v29  ;;  %v974_v25 = vld [vmem:[#allocation4 + $0x1c8] sm:$0xff] }
  0x50   : > { %723 = vmatpush.msrb.mxu1 %v700_v27  ;;  %v971_v27 = vld [vmem:[#allocation4 + $0x1b0] sm:$0xff] }
  0x52   : > { %724 = vmatpush.msrb.mxu1 %v697_v30  ;;  %v1005_v30 = vld [vmem:[#allocation4 + $0x2c0] sm:$0xff] }
  0x54   : > { %725 = vmatpush.msrb.mxu1 %v694_v31  ;;  %v958_v31 = vld [vmem:[#allocation4 + $0x148] sm:$0xff] }
  0x56   : > { %726 = vmatpush.msrb.mxu1 %v691_v32  ;;  %v965_v32 = vld [vmem:[#allocation4 + $0x180] sm:$0xff] }
  0x58   : > { %727 = vmatpush.msrb.mxu1 %v688_v33  ;;  %v963_v33 = vld [vmem:[#allocation4 + $0x170] sm:$0xff] }
  0x59   : > { %2406 = vmatmul.msk.f32.vlgmr.msrb.gmra.mxu1 %vm453_vm0, %v2891_v29 }
  0x5a   : > { %1059 = vmatpush.msra.mxu1 %v963_v33 }
  0xac   : > { %v514_v35 = vpop.f32.mrf.mxu2 }
  0xad   : > { %v559_v36 = vpop.f32.mrf.mxu3 }
  0xae   : > { %v775_v58 = vrot.slane %v559_v36, 4  ;;  %v1012_v36 = vld [vmem:[#allocation4 + $0x2f8] sm:$0xff] }
  0xb3   : > { %v474_v34 = vpop.f32.mrf.mxu1 }
  0xb4   : > { %v791_v0 = vsel %vm790_vm1, %v474_v34, %v775_v58  ;;  %v1002_v34 = vld [vmem:[#allocation4 + $0x2a8] sm:$0xff]  ;;  %v984_v58 = vld [vmem:[#allocation4 + $0x218] sm:$0xff] }
  0xb9   : > { %v579_v40 = vpop.f32.mrf.mxu0 }
  0xba   : > { %v776_v43 = vrot.slane %v579_v40, 4  ;;  %v1009_v40 = vld [vmem:[#allocation4 + $0x2e0] sm:$0xff] }
  0xbb   : > { %v494_v37 = vpop.f32.mrf.mxu1  ;;  %v644_v38 = vpop.f32.mrf.mxu2 }
  0xbc   : > { %v792_v51 = vsel %vm790_vm1, %v494_v37, %v776_v43  ;;  %v960_v37 = vld [vmem:[#allocation4 + $0x158] sm:$0xff]  ;;  %v949_v43 = vld [vmem:[#allocation4 + $0x100] sm:$0xff] }
  0xbd   : > { %1060 = vmatpush.msra.mxu1 %v960_v37  ;;  %v967_v37 = vld [vmem:[#allocation4 + $0x190] sm:$0xff] }
  0xc4   : > { %v664_v39 = vpop.f32.mrf.mxu3 }
  0xc6   : > { %v599_v41 = vpop.f32.mrf.mxu1 }
  0xc7   : > { %v777_v46 = vrot.slane %v599_v41, 4  ;;  %v957_v41 = vld [vmem:[#allocation4 + $0x140] sm:$0xff] }
  0xc8   : > { %1061 = vmatpush.msra.mxu1 %v957_v41 }
  0xc9   : > { %v793_v53 = vsel %vm790_vm1, %v514_v35, %v777_v46  ;;  %v955_v35 = vld [vmem:[#allocation4 + $0x130] sm:$0xff]  ;;  %v993_v46 = vld [vmem:[#allocation4 + $0x260] sm:$0xff] }
  0xcb   : > { %v684_v48 = vpop.f32.mrf.mxu0 }
  0xcc   : > { %v749_v42 = vpop.f32.mrf.mxu2 }
  0xcd   : > { %v785_v44 = vrot.slane %v749_v42, 4  ;;  %v769_v45 = vpop.f32.mrf.mxu3  ;;  %v996_v42 = vld [vmem:[#allocation4 + $0x278] sm:$0xff] }
  0xce   : > { %v786_v47 = vrot.slane %v769_v45, 4  ;;  %v954_v45 = vld [vmem:[#allocation4 + $0x128] sm:$0xff] }
  0xcf   : > { %v795_v49 = vsel %vm790_vm1, %v664_v39, %v785_v44  ;;  %v952_v39 = vld [vmem:[#allocation4 + $0x118] sm:$0xff]  ;;  %v1006_v44 = vld [vmem:[#allocation4 + $0x2c8] sm:$0xff]  ;;  %1062 = vmatpush.msra.mxu1 %v954_v45 }
  0xd0   : > { %v796_v29 = vsel %vm790_vm1, %v684_v48, %v786_v47  ;;  %836 = vmatpush.msrb.mxu3 %v795_v49  ;;  %v946_v47 = vld [vmem:[#allocation4 + $0xe8] sm:$0xff]  ;;  %v1003_v48 = vld [vmem:[#allocation4 + $0x2b0] sm:$0xff] }
  0xd1   : > { %856 = vmatpush.msrb.mxu2 %v796_v29  ;;  %v951_v49 = vld [vmem:[#allocation4 + $0x110] sm:$0xff]  ;;  %v990_v29 = vld [vmem:[#allocation4 + $0x248] sm:$0xff] }
  0xd2   : > { %837 = vmatpush.msrb.mxu3 %v792_v51  ;;  %v1000_v51 = vld [vmem:[#allocation4 + $0x298] sm:$0xff]  ;;  %1063 = vmatpush.msra.mxu1 %v951_v49 }
  0xd3   : > { %857 = vmatpush.msrb.mxu2 %v793_v53  ;;  %2410 = vmatmul.msk.f32.vlgmr.msrb.gmra.mxu3 %vm798_vm2, %v797_v50  ;;  %v987_v53 = vld [vmem:[#allocation4 + $0x230] sm:$0xff] }
  0xd4   : > { %2411 = vmatmul.msk.f32.vlgmr.msrb.gmra.mxu2 %vm798_vm2, %v797_v50  ;;  %1019 = vmatpush.msra.mxu3 %v962_v52  ;;  %v948_v52 = vld [vmem:[#allocation4 + $0xf8] sm:$0xff] }
  0xd5   : > { %1079 = vmatpush.msra.mxu2 %v1011_v57  ;;  %1064 = vmatpush.msra.mxu1 %v948_v52  ;;  %v945_v57 = vld [vmem:[#allocation4 + $0xe0] sm:$0xff] }
  0xd6   : > { %v729_v55 = vpop.f32.mrf.mxu1  ;;  %1020 = vmatpush.msra.mxu3 %v959_v54  ;;  %v940_v54 = vld [vmem:[#allocation4 + $0xb8] sm:$0xff] }
  0xd7   : > { %v784_v59 = vrot.slane %v729_v55, 4  ;;  %1080 = vmatpush.msra.mxu2 %v1008_v61  ;;  %v997_v55 = vld [vmem:[#allocation4 + $0x280] sm:$0xff]  ;;  %1065 = vmatpush.msra.mxu1 %v945_v57  ;;  %v942_v61 = vld [vmem:[#allocation4 + $0xc8] sm:$0xff]  ;;  %v2952_v57 = vld [vmem:[%s3468_s6] sm:$0x3f] }
  0xd8   : > { %1021 = vmatpush.msra.mxu3 %v956_v56  ;;  %v916_v56 = vld [vmem:[%s421_s27] sm:$0xff] }
  0xd9   : > { %v794_v62 = vsel %vm790_vm1, %v644_v38, %v784_v59  ;;  %1081 = vmatpush.msra.mxu2 %v1005_v30  ;;  %v999_v38 = vld [vmem:[#allocation4 + $0x290] sm:$0xff]  ;;  %1014 = vst [vmem:[#allocation1] ss:$2 sm:$0xff] %v916_v56  ;;  %v937_v59 = vld [vmem:[#allocation4 + $0xa0] sm:$0xff]  ;;  %1066 = vmatpush.msra.mxu1 %v942_v61  ;;  %v970_v30 = vld [vmem:[#allocation4 + $0x1a8] sm:$0xff]  ;;  %v905_v61 = vperm.slane %v2952_v57, 3 }
  0xda   : > { %816 = vmatpush.msra.mxu0 %v794_v62  ;;  %1022 = vmatpush.msra.mxu3 %v953_v60  ;;  %v994_v60 = vld [vmem:[#allocation4 + $0x268] sm:$0xff]  ;;  %v981_v62 = vld [vmem:[#allocation4 + $0x200] sm:$0xff] }
  0xdb   : > { %1082 = vmatpush.msra.mxu2 %v1002_v34 }
  0xdc   : > { %817 = vmatpush.msra.mxu0 %v791_v0  ;;  %1023 = vmatpush.msra.mxu3 %v950_v63  ;;  %v934_v63 = vld [vmem:[#allocation4 + $0x88] sm:$0xff]  ;;  %v991_v0 = vld [vmem:[#allocation4 + $0x250] sm:$0xff] }
  0xdd   : > { %2409 = vmatmul.msk.f32.vlgmr.msra.gmra.mxu0 %vm798_vm2, %v797_v50  ;;  %1083 = vmatpush.msra.mxu2 %v999_v38  ;;  %v943_v50 = vld [vmem:[#allocation4 + $0xd0] sm:$0xff] }
  0xde   : > { %1039 = vmatpush.msrb.mxu0 %v1010_v1  ;;  %1024 = vmatpush.msra.mxu3 %v947_v2  ;;  %v939_v1 = vld [vmem:[#allocation4 + $0xb0] sm:$0xff]  ;;  %v978_v2 = vld [vmem:[#allocation4 + $0x1e8] sm:$0xff] }
  0xdf   : > { %1084 = vmatpush.msra.mxu2 %v996_v42  ;;  %1067 = vmatpush.msra.mxu1 %v939_v1 }
  0xe0   : > { %1040 = vmatpush.msrb.mxu0 %v1007_v3  ;;  %1025 = vmatpush.msra.mxu3 %v944_v4  ;;  %v931_v3 = vld [vmem:[#allocation4 + $0x70] sm:$0xff]  ;;  %v988_v4 = vld [vmem:[#allocation4 + $0x238] sm:$0xff] }
  0xe1   : > { %1085 = vmatpush.msra.mxu2 %v993_v46 }
  0xe2   : > { %1041 = vmatpush.msrb.mxu0 %v1004_v5  ;;  %1026 = vmatpush.msra.mxu3 %v941_v6  ;;  %v936_v5 = vld [vmem:[#allocation4 + $0x98] sm:$0xff]  ;;  %v975_v6 = vld [vmem:[#allocation4 + $0x1d0] sm:$0xff] }
  0xe3   : > { %1086 = vmatpush.msra.mxu2 %v990_v29  ;;  %1068 = vmatpush.msra.mxu1 %v936_v5  ;;  %v911_v5 = vperm.slane %v905_v61, 1 }
  0xe4   : > { %1042 = vmatpush.msrb.mxu0 %v1001_v7  ;;  %1027 = vmatpush.msra.mxu3 %v938_v8  ;;  %v1015_v7 = vld.sshfl [vmem:[#allocation1] sm:$0xff pattern:$0x75316420] }
  0xe5   : > { %1087 = vmatpush.msra.mxu2 %v987_v53  ;;  %v928_v8 = vld [vmem:[#allocation4 + $0x58] sm:$0xff] }
  0xe6   : > { %1043 = vmatpush.msrb.mxu0 %v998_v9  ;;  %1028 = vmatpush.msra.mxu3 %v935_v10  ;;  %v985_v9 = vld [vmem:[#allocation4 + $0x220] sm:$0xff] }
  0xe7   : > { %1088 = vmatpush.msra.mxu2 %v984_v58  ;;  %v933_v10 = vld [vmem:[#allocation4 + $0x80] sm:$0xff] }
  0xe8   : > { %1044 = vmatpush.msrb.mxu0 %v995_v11  ;;  %1029 = vmatpush.msra.mxu3 %v932_v12  ;;  %v972_v11 = vld [vmem:[#allocation4 + $0x1b8] sm:$0xff]  ;;  %v925_v12 = vld [vmem:[#allocation4 + $0x40] sm:$0xff] }
  0xe9   : > { %1089 = vmatpush.msra.mxu2 %v981_v62  ;;  %1069 = vmatpush.msra.mxu1 %v933_v10  ;;  %v906_v62 = vperm.slane %v2952_v57, 5 }
  0xea   : > { %1045 = vmatpush.msrb.mxu0 %v992_v13  ;;  %1030 = vmatpush.msra.mxu3 %v929_v14  ;;  %v982_v13 = vld [vmem:[#allocation4 + $0x208] sm:$0xff] }
  0xeb   : > { %1090 = vmatpush.msra.mxu2 %v978_v2  ;;  %v930_v14 = vld [vmem:[#allocation4 + $0x68] sm:$0xff] }
  0xec   : > { %1046 = vmatpush.msrb.mxu0 %v989_v15  ;;  %1031 = vmatpush.msra.mxu3 %v926_v16  ;;  %v969_v15 = vld [vmem:[#allocation4 + $0x1a0] sm:$0xff]  ;;  %v922_v16 = vld [vmem:[#allocation4 + $0x28] sm:$0xff] }
  0xed   : > { %1091 = vmatpush.msra.mxu2 %v975_v6  ;;  %1070 = vmatpush.msra.mxu1 %v930_v14 }
  0xee   : > { %1047 = vmatpush.msrb.mxu0 %v986_v17  ;;  %1032 = vmatpush.msra.mxu3 %v923_v18  ;;  %v979_v17 = vld [vmem:[#allocation4 + $0x1f0] sm:$0xff]  ;;  %v1016_v18 = vld.sshfl [vmem:[#allocation1 + $0x8] sm:$0xff pattern:$0x75316420] }
  0xef   : > { %1092 = vmatpush.msra.mxu2 %v972_v11  ;;  %v912_v11 = vperm.slane %v906_v62, 1 }
  0xf0   : > { %1048 = vmatpush.msrb.mxu0 %v983_v19  ;;  %1033 = vmatpush.msra.mxu3 %v920_v20  ;;  %v927_v19 = vld [vmem:[#allocation4 + $0x50] sm:$0xff]  ;;  %v966_v20 = vld [vmem:[#allocation4 + $0x188] sm:$0xff] }
  0xf1   : > { %1093 = vmatpush.msra.mxu2 %v969_v15  ;;  %1071 = vmatpush.msra.mxu1 %v927_v19 }
  0xf2   : > { %1049 = vmatpush.msrb.mxu0 %v980_v21  ;;  %1034 = vmatpush.msra.mxu3 %v917_v22  ;;  %v919_v21 = vld [vmem:[#allocation4 + $0x10] sm:$0xff]  ;;  %v976_v22 = vld [vmem:[#allocation4 + $0x1d8] sm:$0xff] }
  0xf3   : > { %1035 = vmatmul.f32.vlgmr.msra.gmra.mxu3 %v1015_v7  ;;  %1094 = vmatpush.msra.mxu2 %v966_v20 }
  0xf4   : > { %1050 = vmatpush.msrb.mxu0 %v977_v23  ;;  %1099 = vmatpush.msrb.mxu3 %v964_v24  ;;  %v924_v23 = vld [vmem:[#allocation4 + $0x38] sm:$0xff] }
  0xf5   : > { %1095 = vmatmul.f32.vlgmr.msra.gmra.mxu2 %v1016_v18  ;;  %1072 = vmatpush.msra.mxu1 %v924_v23 }
  0xf6   : > { %1051 = vmatpush.msrb.mxu0 %v974_v25  ;;  %1100 = vmatpush.msrb.mxu3 %v961_v26  ;;  %v973_v25 = vld [vmem:[#allocation4 + $0x1c0] sm:$0xff] }
  0xf8   : > { %1052 = vmatpush.msrb.mxu0 %v971_v27  ;;  %1101 = vmatpush.msrb.mxu3 %v958_v31  ;;  %v921_v27 = vld [vmem:[#allocation4 + $0x20] sm:$0xff] }
  0xf9   : > { %1073 = vmatpush.msra.mxu1 %v921_v27 }
  0xfa   : > { %1053 = vmatpush.msrb.mxu0 %v968_v28  ;;  %1102 = vmatpush.msrb.mxu3 %v955_v35 }
  0xfc   : > { %1054 = vmatpush.msrb.mxu0 %v965_v32  ;;  %1103 = vmatpush.msrb.mxu3 %v952_v39  ;;  %v918_v32 = vld [vmem:[#allocation4 + $0x8] sm:$0xff] }
  0xfd   : > { %1055 = vmatmul.f32.vlgmr.msrb.gmra.mxu0 %v1016_v18  ;;  %1074 = vmatpush.msra.mxu1 %v918_v32  ;;  %v1151_v32 = vld [vmem:[%s3469_s7] sm:$0xff] }
  0xfe   : > { %1119 = vmatpush.msra.mxu0 %v1012_v36  ;;  %1104 = vmatpush.msrb.mxu3 %v949_v43 }
  0xff   : > { %1075 = vmatmul.f32.vlgmr.msra.gmra.mxu1 %v1015_v7 }
 0x100   : > { %1120 = vmatpush.msra.mxu0 %v1009_v40  ;;  %1105 = vmatpush.msrb.mxu3 %v946_v47 }
 0x102   : > { %1121 = vmatpush.msra.mxu0 %v1006_v44  ;;  %1106 = vmatpush.msrb.mxu3 %v943_v50 }
 0x104   : > { %1122 = vmatpush.msra.mxu0 %v1003_v48  ;;  %1107 = vmatpush.msrb.mxu3 %v940_v54 }
 0x106   : > { %1123 = vmatpush.msra.mxu0 %v1000_v51  ;;  %1108 = vmatpush.msrb.mxu3 %v937_v59 }
 0x108   : > { %1124 = vmatpush.msra.mxu0 %v997_v55  ;;  %1109 = vmatpush.msrb.mxu3 %v934_v63 }
 0x10a   : > { %1125 = vmatpush.msra.mxu0 %v994_v60  ;;  %1110 = vmatpush.msrb.mxu3 %v931_v3  ;;  %v904_v60 = vperm.slane %v2952_v57, 1 }
 0x10c   : > { %1126 = vmatpush.msra.mxu0 %v991_v0  ;;  %1111 = vmatpush.msrb.mxu3 %v928_v8 }
 0x10e   : > { %1127 = vmatpush.msra.mxu0 %v988_v4  ;;  %1112 = vmatpush.msrb.mxu3 %v925_v12  ;;  %v910_v4 = vperm.slane %v904_v60, 1 }
 0x110   : > { %1128 = vmatpush.msra.mxu0 %v985_v9  ;;  %1113 = vmatpush.msrb.mxu3 %v922_v16 }
 0x112   : > { %1129 = vmatpush.msra.mxu0 %v982_v13  ;;  %1114 = vmatpush.msrb.mxu3 %v919_v21 }
 0x113   : > { %1115 = vmatmul.f32.vlgmr.msrb.gmra.mxu3 %v1015_v7 }
 0x114   : > { %1130 = vmatpush.msra.mxu0 %v979_v17 }
 0x116   : > { %1131 = vmatpush.msra.mxu0 %v976_v22 }
 0x118   : > { %1132 = vmatpush.msra.mxu0 %v973_v25 }
 0x11a   : > { %1133 = vmatpush.msra.mxu0 %v970_v30 }
 0x11c   : > { %1134 = vmatpush.msra.mxu0 %v967_v37 }
 0x11d   : > { %1135 = vmatmul.f32.vlgmr.msra.gmra.mxu0 %v1016_v18 }
 0x156   : > { %v2933_v24 = vpop.f32.mrf.mxu3 }
 0x157   : > { %v2935_v26 = vpop.f32.mrf.mxu2  ;;  %v863_v28 = vsel %vm790_vm1, %v2933_v24, 0.0  ;;  %v871_v34 = vmul.f32 %v2933_v24, %v2933_v24 }
 0x158   : > { %v865_v36 = vsel %vm790_vm1, %v2935_v26, 0.0  ;;  %v872_v40 = vmul.f32 %v2935_v26, %v2935_v26 }
 0x159   : > { %v874_v42 = vsel %vm790_vm1, %v871_v34, 0.0  ;;  %v1152_v34 = vld [vmem:[%s3469_s7 + $0x8] sm:$0xff] }
 0x15a   : > { %v819_v31 = vpop.f32.mrf.mxu0  ;;  %v876_v44 = vsel %vm790_vm1, %v872_v40, 0.0 }
 0x15b   : > { %v870_v33 = vmul.f32 %v819_v31, %v819_v31  ;;  %v862_v35 = vsel %vm790_vm1, %v819_v31, 0.0 }
 0x15c   : > { %v864_v38 = vadd.f32 %v863_v28, %v862_v35 }
 0x15d   : > { %v873_v41 = vsel %vm790_vm1, %v870_v33, 0.0 }
 0x15e   : > { %v866_v39 = vadd.f32 %v865_v36, %v864_v38  ;;  %v875_v43 = vadd.f32 %v874_v42, %v873_v41 }
 0x160   : > { %867 = vadd.xlane.f32.xlu0 %v866_v39  ;;  %v877_v45 = vadd.f32 %v876_v44, %v875_v43 }
 0x168   : > { %878 = vadd.xlane.f32.xlu0 %v877_v45 }
 0x176   : > { %v1036_v55 = vpop.f32.mrf.mxu3 }
 0x178   : > { %v1096_v9 = vpop.f32.mrf.mxu2 }
 0x17a   : > { %v1056_v56 = vpop.f32.mrf.mxu0 }
 0x17b   : > { %v1057_v17 = vadd.f32 %v1056_v56, %v1036_v55 }
 0x17c   : > { %v1076_v7 = vpop.f32.mrf.mxu1 }
 0x17d   : > { %v1097_v18 = vadd.f32 %v1096_v9, %v1076_v7 }
 0x196   : > { %v1116_v12 = vpop.f32.mrf.mxu3 }
 0x19a   : > { %v1136_v13 = vpop.f32.mrf.mxu0 }
 0x19b   : > { %v1137_v22 = vadd.f32 %v1136_v13, %v1116_v12 }
 0x1d3   : > { %v868_v46 = vpop.xlane.xlu0 %867 }
 0x1d4   : > { %v869_v47 = vmul.f32 0.00390625, %v868_v46 }
 0x1d6   : > { %v881_v49 = vmul.f32 %v869_v47, %v869_v47  ;;  %v883_v0 = vsub.f32 %v819_v31, %v869_v47  ;;  %v884_v1 = vsub.f32 %v2933_v24, %v869_v47  ;;  %v885_v2 = vsub.f32 %v2935_v26, %v869_v47 }
 0x1db   : > { %v879_v48 = vpop.xlane.xlu0 %878 }
 0x1dc   : > { %v880_v29 = vmul.f32 0.00390625, %v879_v48 }
 0x1de   : > { %v882_v50 = vsub.f32 %v880_v29, %v881_v49 }
 0x1e0   : > { %v886_v51 = vadd.f32 1e-05, %v882_v50 }
 0x1e2   : > { %2645 = vrsqrt.f32 %v886_v51  ;;  %vm893_vm4 = vweird.f32 %v886_v51 }
 0x1e8   : > { %v2646_v52 = vpop.eup %2645 }
 0x1e9   : > { %v888_v53 = vmul.f32 %v2646_v52, %v886_v51  ;;  %vm894_vm3 = vweird.f32 %v2646_v52 }
 0x1ea   : > { %vm895_vm5 = vmor %vm893_vm4, %vm894_vm3 }
 0x1eb   : > { %v889_v54 = vmul.f32 %v2646_v52, %v888_v53 }
 0x1ed   : > { %v890_v58 = vmul.f32 0.5, %v889_v54 }
 0x1ef   : > { %v891_v59 = vsub.f32 1.5, %v890_v58 }
 0x1f1   : > { %v892_v63 = vmul.f32 %v2646_v52, %v891_v59 }
 0x1f3   : > { %v896_v3 = vsel %vm895_vm5, %v2646_v52, %v892_v63 }
 0x1f4   : > { %v897_v6 = vmul.f32 %v896_v3, %v883_v0  ;;  %v898_v8 = vmul.f32 %v896_v3, %v884_v1  ;;  %v899_v10 = vmul.f32 %v896_v3, %v885_v2 }
 0x1f6   : > { %v900_v14 = vmax.f32 %v897_v6, 0.0  ;;  %v901_v15 = vmax.f32 %v898_v8, 0.0  ;;  %v902_v16 = vmax.f32 %v899_v10, 0.0 }
 0x1f8   : > { %v913_v19 = vmul.f32 %v910_v4, %v900_v14  ;;  %v914_v20 = vmul.f32 %v911_v5, %v901_v15  ;;  %v915_v21 = vmul.f32 %v912_v11, %v902_v16  ;;  %v1293_v16 = vld [vmem:[%s3470_s8] sm:$0xff] }
 0x1fa   : > { %v1142_v23 = vrot.slane %v913_v19, 4  ;;  %v1143_v24 = vrot.slane %v914_v20, 4  ;;  %v1144_v25 = vrot.slane %v915_v21, 4 }
 0x1fc   : > { %v2960_v26 = vsel %vm790_vm1, %v1057_v17, %v1142_v23  ;;  %v2963_v27 = vsel %vm790_vm1, %v1097_v18, %v1143_v24  ;;  %v2966_v28 = vsel %vm790_vm1, %v1137_v22, %v1144_v25  ;;  %v1294_v24 = vld [vmem:[%s3470_s8 + $0x8] sm:$0xff] }
 0x1fd   : > { %1386 = vrot.lane.b32.xlu0 %v2966_v28, %s2772_s30  ;;  %1400 = vrot.lane.b32.xlu2 %v2966_v28, %s2773_s11  ;;  %v2485_v30 = vpack.i.bf16 %v2963_v27, %v2960_v26  ;;  %v2515_v31 = vpack.i.bf16 %v2960_v26, %v2966_v28 }
 0x1fe   : > { %1175 = vmatpush.msrb.mxu1 %v2960_v26  ;;  %1198 = vmatpush.msrb.mxu2 %v2963_v27 }
 0x1ff   : > { %2486 = vrot.lane.b32.xlu1 %v2485_v30, %s2773_s11  ;;  %2412 = vmatmul.msk.f32.vlgmr.msrb.gmra.mxu1 %vm1153_vm6, %v1151_v32 }
 0x200   : > { %1221 = vmatpush.msra.mxu1 %v2966_v28  ;;  %2414 = vmatmul.msk.f32.vlgmr.msrb.gmra.mxu2 %vm1153_vm6, %v1151_v32 }
 0x205   : > { %2516 = vrot.lane.b32.xlu0 %v2515_v31, %s2774_s12  ;;  %2496 = vrot.lane.b32.xlu2 %v2485_v30, %s2775_s15 }
 0x207   : > { %2491 = vrot.lane.b32.xlu1 %v2485_v30, %s2772_s30  ;;  %2413 = vmatmul.msk.f32.gmra.mxu1 %vm1153_vm6, %v1152_v34 }
 0x208   : > { %2415 = vmatmul.msk.f32.gmra.mxu2 %vm1153_vm6, %v1152_v34 }
 0x20d   : > { %1317 = vrot.lane.b32.xlu0 %v2963_v27, %s2774_s12  ;;  %1372 = vrot.lane.b32.xlu2 %v2966_v28, %s2775_s15 }
 0x20f   : > { %2501 = vrot.lane.b32.xlu1 %v2485_v30, %s2776_s16  ;;  %2416 = vmatmul.msk.f32.vlgmr.msra.gmra.mxu1 %vm1153_vm6, %v1151_v32 }
 0x215   : > { %2506 = vrot.lane.b32.xlu2 %v2515_v31, %s2777_s19 }
 0x217   : > { %1358 = vrot.lane.b32.xlu1 %v2966_v28, %s2776_s16  ;;  %2417 = vmatmul.msk.f32.gmra.mxu1 %vm1153_vm6, %v1152_v34 }
 0x21d   : > { %1345 = vrot.lane.b32.xlu2 %v2963_v27, %s2777_s19 }
 0x21f   : > { %2511 = vrot.lane.b32.xlu1 %v2515_v31, %s2778_s17 }
 0x225   : > { %2521 = vrot.lane.b32.xlu2 %v2515_v31, %s2779_s18 }
 0x227   : > { %1331 = vrot.lane.b32.xlu1 %v2963_v27, %s2778_s17 }
 0x22f   : > { %1303 = vrot.lane.b32.xlu1 %v2963_v27, %s2779_s18 }
 0x257   : > { %v1401_v33 = vpop.permute.xlu2 %1400 }
 0x25f   : > { %v2497_v35 = vpop.permute.xlu2 %2496 }
 0x260   : > { %v2499_v44 = vunpack.i.h.bf16 %v2497_v35  ;;  %v2498_v45 = vunpack.i.l.bf16 %v2497_v35  ;;  %v1486_v35 = vperm.slane %v2952_v57, 0 }
 0x262   : > { %v1375_v52 = vsel %vm1374_vm9, %v2498_v45, %v2499_v44 }
 0x267   : > { %v1373_v39 = vpop.permute.xlu2 %1372 }
 0x268   : > { %v1376_v53 = vsel %vm1374_vm9, %v2499_v44, %v1373_v39  ;;  %v1381_v54 = vsel %vm1374_vm9, %v1373_v39, %v2498_v45 }
 0x26f   : > { %v1387_v48 = vpop.permute.xlu0 %1386  ;;  %v2507_v51 = vpop.permute.xlu2 %2506 }
 0x270   : > { %v2509_v59 = vunpack.i.h.bf16 %v2507_v51  ;;  %v2508_v60 = vunpack.i.l.bf16 %v2507_v51 }
 0x271   : > { %v2487_v36 = vpop.permute.xlu1 %2486 }
 0x272   : > { %v2489_v37 = vunpack.i.h.bf16 %v2487_v36  ;;  %v2488_v38 = vunpack.i.l.bf16 %v2487_v36  ;;  %v1353_v63 = vsel %vm1347_vm11, %v2508_v60, %v2509_v59  ;;  %v1487_v36 = vperm.slane %v2952_v57, 2 }
 0x274   : > { %v1403_v40 = vsel %vm1402_vm7, %v2488_v38, %v2489_v37  ;;  %v1404_v41 = vsel %vm1402_vm7, %v2489_v37, %v1401_v33  ;;  %v1409_v42 = vsel %vm1402_vm7, %v1401_v33, %v2488_v38  ;;  %v3066_v38 = vperm.slane %v1486_v35, 0 }
 0x275   : > { %1424 = vmatpush.msra.mxu2 %v1403_v40  ;;  %1447 = vmatpush.msrb.mxu1 %v1404_v41  ;;  %v3068_v39 = vperm.slane %v1487_v36, 0  ;;  %v1488_v40 = vperm.slane %v2952_v57, 4 }
 0x276   : > { %1470 = vmatpush.msra.mxu3 %v1409_v42 }
 0x277   : > { %v1346_v62 = vpop.permute.xlu2 %1345  ;;  %v2517_v5 = vpop.permute.xlu0 %2516  ;;  %v3077_v44 = vperm.slane %v1488_v40, 0 }
 0x278   : > { %v1348_v3 = vsel %vm1347_vm11, %v2509_v59, %v1346_v62  ;;  %v1349_v4 = vsel %vm1347_vm11, %v1346_v62, %v2508_v60  ;;  %v2519_v8 = vunpack.i.h.bf16 %v2517_v5  ;;  %v2518_v9 = vunpack.i.l.bf16 %v2517_v5 }
 0x279   : > { %v2492_v43 = vpop.permute.xlu1 %2491 }
 0x27a   : > { %v2494_v46 = vunpack.i.h.bf16 %v2492_v43  ;;  %v2493_v47 = vunpack.i.l.bf16 %v2492_v43  ;;  %v1325_v15 = vsel %vm1319_vm13, %v2518_v9, %v2519_v8 }
 0x27c   : > { %v1389_v49 = vsel %vm1388_vm8, %v2493_v47, %v2494_v46  ;;  %v1390_v29 = vsel %vm1388_vm8, %v2494_v46, %v1387_v48  ;;  %v1395_v50 = vsel %vm1388_vm8, %v1387_v48, %v2493_v47 }
 0x27d   : > { %1425 = vmatpush.msra.mxu2 %v1389_v49  ;;  %1448 = vmatpush.msrb.mxu1 %v1390_v29 }
 0x27e   : > { %1471 = vmatpush.msra.mxu3 %v1395_v50 }
 0x27f   : > { %1426 = vmatpush.msra.mxu2 %v1375_v52  ;;  %1449 = vmatpush.msrb.mxu1 %v1376_v53  ;;  %v2522_v6 = vpop.permute.xlu2 %2521  ;;  %v1318_v18 = vpop.permute.xlu0 %1317 }
 0x280   : > { %1472 = vmatpush.msra.mxu3 %v1381_v54  ;;  %v2524_v12 = vunpack.i.h.bf16 %v2522_v6  ;;  %v2523_v13 = vunpack.i.l.bf16 %v2522_v6  ;;  %v1320_v22 = vsel %vm1319_vm13, %v2519_v8, %v1318_v18  ;;  %v1321_v23 = vsel %vm1319_vm13, %v1318_v18, %v2518_v9 }
 0x281   : > { %v2502_v55 = vpop.permute.xlu1 %2501 }
 0x282   : > { %v2504_v56 = vunpack.i.h.bf16 %v2502_v55  ;;  %v2503_v58 = vunpack.i.l.bf16 %v2502_v55  ;;  %v1311_v17 = vsel %vm3473_vm14, %v2523_v13, %v2524_v12 }
 0x283   : > { %v3054_v31 = vpop.f32.mrf.mxu2 }
 0x284   : > { %v1361_v61 = vsel %vm1360_vm10, %v2503_v58, %v2504_v56 }
 0x285   : > { %1427 = vmatpush.msra.mxu2 %v1361_v61 }
 0x287   : > { %1428 = vmatpush.msra.mxu2 %v2960_v26 }
 0x289   : > { %v1359_v0 = vpop.permute.xlu1 %1358  ;;  %1429 = vmatpush.msra.mxu2 %v1353_v63 }
 0x28a   : > { %v1362_v1 = vsel %vm1360_vm10, %v2504_v56, %v1359_v0  ;;  %v1367_v2 = vsel %vm1360_vm10, %v1359_v0, %v2503_v58 }
 0x28b   : > { %1450 = vmatpush.msrb.mxu1 %v1362_v1  ;;  %1473 = vmatpush.msra.mxu3 %v1367_v2  ;;  %v3058_v33 = vpop.f32.mrf.mxu2 }
 0x28d   : > { %1451 = vmatpush.msrb.mxu1 %v2963_v27  ;;  %1474 = vmatpush.msra.mxu3 %v2966_v28  ;;  %v3050_v28 = vpop.f32.mrf.mxu1 }
 0x28f   : > { %1452 = vmatpush.msrb.mxu1 %v1348_v3  ;;  %1475 = vmatpush.msra.mxu3 %v1349_v4 }
 0x291   : > { %v2512_v7 = vpop.permute.xlu1 %2511 }
 0x292   : > { %v2514_v10 = vunpack.i.h.bf16 %v2512_v7  ;;  %v2513_v11 = vunpack.i.l.bf16 %v2512_v7 }
 0x294   : > { %v1339_v14 = vsel %vm1333_vm12, %v2513_v11, %v2514_v10 }
 0x295   : > { %1430 = vmatpush.msra.mxu2 %v1339_v14  ;;  %v3052_v30 = vpop.f32.mrf.mxu1 }
 0x297   : > { %1431 = vmatpush.msra.mxu2 %v1325_v15 }
 0x299   : > { %v1332_v19 = vpop.permute.xlu1 %1331  ;;  %1432 = vmatpush.msra.mxu2 %v1311_v17 }
 0x29a   : > { %v1334_v20 = vsel %vm1333_vm12, %v2514_v10, %v1332_v19  ;;  %v1335_v21 = vsel %vm1333_vm12, %v1332_v19, %v2513_v11  ;;  %2418 = vmatmul.msk.f32.vlgmr.msra.gmra.mxu2 %vm1410_vm15, %v1293_v16 }
 0x29b   : > { %1453 = vmatpush.msrb.mxu1 %v1334_v20  ;;  %1476 = vmatpush.msra.mxu3 %v1335_v21 }
 0x29d   : > { %1454 = vmatpush.msrb.mxu1 %v1320_v22  ;;  %1477 = vmatpush.msra.mxu3 %v1321_v23  ;;  %v3056_v32 = vpop.f32.mrf.mxu1 }
 0x2a1   : > { %v1304_v25 = vpop.permute.xlu1 %1303 }
 0x2a2   : > { %v1306_v26 = vsel %vm3473_vm14, %v2524_v12, %v1304_v25  ;;  %v1307_v27 = vsel %vm3473_vm14, %v1304_v25, %v2523_v13  ;;  %2419 = vmatmul.msk.f32.gmra.mxu2 %vm1410_vm15, %v1294_v24 }
 0x2a3   : > { %1455 = vmatpush.msrb.mxu1 %v1306_v26  ;;  %1478 = vmatpush.msra.mxu3 %v1307_v27 }
 0x2a4   : > { %2422 = vmatmul.msk.f32.vlgmr.msra.gmra.mxu3 %vm1410_vm15, %v1293_v16  ;;  %2420 = vmatmul.msk.f32.vlgmr.msrb.gmra.mxu1 %vm1410_vm15, %v1293_v16 }
 0x2a5   : > { %v3060_v34 = vpop.f32.mrf.mxu1 }
 0x2ac   : > { %2423 = vmatmul.msk.f32.gmra.mxu3 %vm1410_vm15, %v1294_v24  ;;  %2421 = vmatmul.msk.f32.gmra.mxu1 %vm1410_vm15, %v1294_v24 }
 0x31d   : > { %v3064_v37 = vpop.f32.mrf.mxu2 }
 0x31e   : > { %v1495_v42 = vmul.f32 %v3066_v38, %v3064_v37 }
 0x320   : > { %v1511_v58 = vmul.f32 %v1495_v42, %v1495_v42 }
 0x321   : > { %v3071_v41 = vpop.f32.mrf.mxu1 }
 0x322   : > { %v1496_v43 = vmul.f32 %v3068_v39, %v3071_v41 }
 0x324   : > { %v1501_v46 = vadd.f32 %v1496_v43, %v1495_v42  ;;  %v1512_v59 = vmul.f32 %v1496_v43, %v1496_v43 }
 0x325   : > { %v3079_v45 = vpop.f32.mrf.mxu2 }
 0x326   : > { %v1498_v57 = vmul.f32 %v3066_v38, %v3079_v45  ;;  %v1517_v0 = vadd.f32 %v1512_v59, %v1511_v58 }
 0x327   : > { %v3081_v47 = vpop.f32.mrf.mxu3 }
 0x328   : > { %v1497_v48 = vmul.f32 %v3077_v44, %v3081_v47  ;;  %v1514_v51 = vmul.f32 %v1498_v57, %v1498_v57 }
 0x329   : > { %v3087_v49 = vpop.f32.mrf.mxu1 }
 0x32a   : > { %v1502_v29 = vadd.f32 %v1501_v46, %v1497_v48  ;;  %v1499_v50 = vmul.f32 %v3068_v39, %v3087_v49  ;;  %v1513_v63 = vmul.f32 %v1497_v48, %v1497_v48 }
 0x32c   : > { %1503 = vadd.xlane.f32.xlu0 %v1502_v29  ;;  %v1515_v52 = vmul.f32 %v1499_v50, %v1499_v50  ;;  %v1505_v53 = vadd.f32 %v1499_v50, %v1498_v57  ;;  %v1518_v1 = vadd.f32 %v1517_v0, %v1513_v63 }
 0x32e   : > { %v1521_v56 = vadd.f32 %v1515_v52, %v1514_v51 }
 0x32f   : > { %v1483_v54 = vpop.f32.mrf.mxu3 }
 0x330   : > { %v1500_v55 = vmul.f32 %v3077_v44, %v1483_v54 }
 0x332   : > { %v1506_v60 = vadd.f32 %v1505_v53, %v1500_v55  ;;  %v1516_v61 = vmul.f32 %v1500_v55, %v1500_v55 }
 0x334   : > { %1507 = vadd.xlane.f32.xlu2 %v1506_v60  ;;  %v1522_v62 = vadd.f32 %v1521_v56, %v1516_v61 }
 0x336   : > { %1523 = vadd.xlane.f32.xlu1 %v1522_v62 }
 0x33c   : > { %1519 = vadd.xlane.f32.xlu2 %v1518_v1 }
 0x39f   : > { %v1504_v4 = vpop.xlane.xlu0 %1503 }
 0x3a0   : > { %v1509_v8 = vmul.f32 0.00390625, %v1504_v4 }
 0x3a2   : > { %v1527_v12 = vmul.f32 %v1509_v8, %v1509_v8  ;;  %v1531_v43 = vsub.f32 %v3064_v37, %v1509_v8  ;;  %v1532_v46 = vsub.f32 %v3071_v41, %v1509_v8  ;;  %v1533_v57 = vsub.f32 %v3081_v47, %v1509_v8 }
 0x3a7   : > { %v1508_v2 = vpop.xlane.xlu2 %1507 }
 0x3a8   : > { %v1510_v3 = vmul.f32 0.00390625, %v1508_v2 }
 0x3a9   : > { %v1524_v5 = vpop.xlane.xlu1 %1523 }
 0x3aa   : > { %v1526_v6 = vmul.f32 0.00390625, %v1524_v5  ;;  %v1528_v7 = vmul.f32 %v1510_v3, %v1510_v3  ;;  %v1536_v26 = vsub.f32 %v1483_v54, %v1510_v3  ;;  %v1534_v40 = vsub.f32 %v3079_v45, %v1510_v3 }
 0x3ab   : > { %v1535_v48 = vsub.f32 %v3087_v49, %v1510_v3 }
 0x3ac   : > { %v1530_v9 = vsub.f32 %v1526_v6, %v1528_v7 }
 0x3ae   : > { %v1538_v10 = vadd.f32 1e-05, %v1530_v9 }
 0x3af   : > { %v1520_v11 = vpop.xlane.xlu2 %1519 }
 0x3b0   : > { %v1525_v13 = vmul.f32 0.00390625, %v1520_v11  ;;  %2647 = vrsqrt.f32 %v1538_v10  ;;  %vm1555_vm1 = vweird.f32 %v1538_v10  ;;  %v1229_v11 = vadd.f32 %v3054_v31, %v3050_v28 }
 0x3b2   : > { %v1529_v14 = vsub.f32 %v1525_v13, %v1527_v12  ;;  %v1230_v12 = vadd.f32 %v1229_v11, %v3056_v32 }
 0x3b4   : > { %v1537_v15 = vadd.f32 1e-05, %v1529_v14  ;;  %v1239_v14 = vmul.f32 %v3050_v28, %v3050_v28 }
 0x3b6   : > { %2649 = vrsqrt.f32 %v1537_v15  ;;  %v2648_v16 = vpop.eup %2647  ;;  %vm1545_vm5 = vweird.f32 %v1537_v15 }
 0x3b7   : > { %v1550_v17 = vmul.f32 %v2648_v16, %v1538_v10  ;;  %vm1556_vm0 = vweird.f32 %v2648_v16 }
 0x3b8   : > { %vm1557_vm3 = vmor %vm1555_vm1, %vm1556_vm0 }
 0x3b9   : > { %v1551_v18 = vmul.f32 %v2648_v16, %v1550_v17 }
 0x3bb   : > { %v1552_v20 = vmul.f32 0.5, %v1551_v18 }
 0x3bc   : > { %v2650_v19 = vpop.eup %2649 }
 0x3bd   : > { %v1540_v21 = vmul.f32 %v2650_v19, %v1537_v15  ;;  %v1553_v22 = vsub.f32 1.5, %v1552_v20  ;;  %vm1546_vm4 = vweird.f32 %v2650_v19  ;;  %v1240_v15 = vmul.f32 %v3054_v31, %v3054_v31 }
 0x3be   : > { %vm1547_vm6 = vmor %vm1545_vm5, %vm1546_vm4 }
 0x3bf   : > { %v1541_v23 = vmul.f32 %v2650_v19, %v1540_v21  ;;  %v1554_v24 = vmul.f32 %v2648_v16, %v1553_v22  ;;  %v1245_v17 = vadd.f32 %v1240_v15, %v1239_v14 }
 0x3c1   : > { %v1542_v25 = vmul.f32 0.5, %v1541_v23  ;;  %v1558_v27 = vsel %vm1557_vm3, %v2648_v16, %v1554_v24  ;;  %v1241_v16 = vmul.f32 %v3056_v32, %v3056_v32 }
 0x3c2   : > { %v1564_v36 = vmul.f32 %v1558_v27, %v1536_v26  ;;  %v1562_v29 = vmul.f32 %v1558_v27, %v1534_v40  ;;  %v1563_v52 = vmul.f32 %v1558_v27, %v1535_v48 }
 0x3c3   : > { %v1543_v35 = vsub.f32 1.5, %v1542_v25 }
 0x3c4   : > { %v1576_v50 = vmul.f32 0.2, %v1564_v36  ;;  %vm1570_vm15 = vcmp.ge.f32.partialorder %v1564_v36, 0.0  ;;  %vm1568_vm3 = vcmp.ge.f32.partialorder %v1562_v29, 0.0  ;;  %v1574_v49 = vmul.f32 0.2, %v1562_v29 }
 0x3c5   : > { %v1544_v42 = vmul.f32 %v2650_v19, %v1543_v35  ;;  %v1575_v58 = vmul.f32 0.2, %v1563_v52  ;;  %vm1569_vm4 = vcmp.ge.f32.partialorder %v1563_v52, 0.0 }
 0x3c6   : > { %v1582_v37 = vsel %vm1570_vm15, %v1564_v36, %v1576_v50  ;;  %v1580_v2 = vsel %vm1568_vm3, %v1562_v29, %v1574_v49 }
 0x3c7   : > { %v1548_v51 = vsel %vm1547_vm6, %v2650_v19, %v1544_v42  ;;  %v3104_v63 = vmul.f32 %v1582_v37, %v3077_v44  ;;  %v1581_v3 = vsel %vm1569_vm4, %v1563_v52, %v1575_v58  ;;  %v3117_v5 = vmul.f32 %v1580_v2, %v3066_v38 }
 0x3c8   : > { %v1559_v53 = vmul.f32 %v1548_v51, %v1531_v43  ;;  %v1560_v54 = vmul.f32 %v1548_v51, %v1532_v46  ;;  %v1561_v55 = vmul.f32 %v1548_v51, %v1533_v57  ;;  %v3120_v6 = vmul.f32 %v1581_v3, %v3068_v39 }
 0x3c9   : > { %v2585_v8 = vpack.i.bf16 %v3117_v5, %v3104_v63  ;;  %v1246_v19 = vadd.f32 %v1245_v17, %v1241_v16 }
 0x3ca   : > { %vm1565_vm0 = vcmp.ge.f32.partialorder %v1559_v53, 0.0  ;;  %vm1566_vm1 = vcmp.ge.f32.partialorder %v1560_v54, 0.0  ;;  %v1571_v45 = vmul.f32 0.2, %v1559_v53  ;;  %v1572_v56 = vmul.f32 0.2, %v1560_v54 }
 0x3cb   : > { %vm1567_vm14 = vcmp.ge.f32.partialorder %v1561_v55, 0.0  ;;  %v1573_v41 = vmul.f32 0.2, %v1561_v55  ;;  %v2555_v7 = vpack.i.bf16 %v3120_v6, %v3117_v5 }
 0x3cc   : > { %v1577_v59 = vsel %vm1565_vm0, %v1559_v53, %v1571_v45  ;;  %v1578_v47 = vsel %vm1566_vm1, %v1560_v54, %v1572_v56 }
 0x3cd   : > { %v1579_v60 = vsel %vm1567_vm14, %v1561_v55, %v1573_v41  ;;  %v3098_v61 = vmul.f32 %v1577_v59, %v3066_v38  ;;  %v3101_v62 = vmul.f32 %v1578_v47, %v3068_v39 }
 0x3ce   : > { %v3107_v0 = vmul.f32 %v1579_v60, %v3077_v44 }
 0x3cf   : > { %v2545_v1 = vpack.i.bf16 %v3101_v62, %v3098_v61  ;;  %v2590_v10 = vpack.i.bf16 %v3101_v62, %v3120_v6 }
 0x3d0   : > { %v2560_v4 = vpack.i.bf16 %v3107_v0, %v3104_v63  ;;  %v2540_v9 = vpack.i.bf16 %v3098_v61, %v3107_v0 }
 0x3d1   : > { %2546 = vrot.lane.b32.xlu0 %v2545_v1, %s2773_s11  ;;  %2526 = vrot.lane.b32.xlu2 %v2545_v1, %s2772_s30 }
 0x3d2   : > { %2561 = vrot.lane.b32.xlu1 %v2560_v4, %s2772_s30 }
 0x3d9   : > { %2556 = vrot.lane.b32.xlu0 %v2555_v7, %s2772_s30  ;;  %2531 = vrot.lane.b32.xlu2 %v2545_v1, %s2775_s15 }
 0x3da   : > { %2576 = vrot.lane.b32.xlu1 %v2555_v7, %s2776_s16 }
 0x3e1   : > { %2566 = vrot.lane.b32.xlu0 %v2555_v7, %s2775_s15  ;;  %2536 = vrot.lane.b32.xlu2 %v2545_v1, %s2776_s16 }
 0x3e2   : > { %2586 = vrot.lane.b32.xlu1 %v2585_v8, %s2777_s19 }
 0x3e9   : > { %2571 = vrot.lane.b32.xlu0 %v2560_v4, %s2775_s15  ;;  %2541 = vrot.lane.b32.xlu2 %v2540_v9, %s2777_s19 }
 0x3ea   : > { %2596 = vrot.lane.b32.xlu1 %v2555_v7, %s2773_s11 }
 0x3f1   : > { %2581 = vrot.lane.b32.xlu0 %v2560_v4, %s2776_s16  ;;  %2551 = vrot.lane.b32.xlu2 %v2540_v9, %s2778_s17 }
 0x3f2   : > { %2611 = vrot.lane.b32.xlu1 %v2560_v4, %s2773_s11 }
 0x3f9   : > { %2591 = vrot.lane.b32.xlu0 %v2590_v10, %s2777_s19  ;;  %2601 = vrot.lane.b32.xlu2 %v2585_v8, %s2778_s17 }
 0x3fa   : > { %2621 = vrot.lane.b32.xlu1 %v2585_v8, %s2774_s12 }
 0x401   : > { %2616 = vrot.lane.b32.xlu0 %v2590_v10, %s2778_s17  ;;  %2606 = vrot.lane.b32.xlu2 %v2540_v9, %s2774_s12  ;;  %s2433_s17 = sshll.u32 %s3483_s14, 5 }
 0x402   : > { %2631 = vrot.lane.b32.xlu1 %v2585_v8, %s2779_s18  ;;  %s426_s21 = scalar_lea.vmem %s3472_s10, %s2433_s17 }
 0x409   : > { %2626 = vrot.lane.b32.xlu0 %v2590_v10, %s2774_s12  ;;  %2636 = vrot.lane.b32.xlu2 %v2540_v9, %s2779_s18 }
 0x411   : > { %2641 = vrot.lane.b32.xlu0 %v2590_v10, %s2779_s18 }
 0x42b   : > { %v3154_v13 = vpop.permute.xlu2 %2526 }
 0x42c   : > { %1231 = vadd.xlane.f32.xlu1 %v1230_v12  ;;  %v2529_v24 = vunpack.i.h.bf16 %v3154_v13  ;;  %v2528_v25 = vunpack.i.l.bf16 %v3154_v13 }
 0x42e   : > { %v1767_v48 = vsel %vm1388_vm8, %v2528_v25, %v2529_v24 }
 0x433   : > { %v3162_v18 = vpop.permute.xlu2 %2531 }
 0x434   : > { %v2534_v50 = vunpack.i.h.bf16 %v3162_v18  ;;  %v2533_v51 = vunpack.i.l.bf16 %v3162_v18 }
 0x436   : > { %v1741_v58 = vsel %vm1374_vm9, %v2533_v51, %v2534_v50 }
 0x43b   : > { %1247 = vadd.xlane.f32.xlu0 %v1246_v19  ;;  %v3164_v20 = vpop.permute.xlu2 %2536 }
 0x43c   : > { %v2539_v41 = vunpack.i.h.bf16 %v3164_v20  ;;  %v2538_v49 = vunpack.i.l.bf16 %v3164_v20 }
 0x43e   : > { %v1715_v3 = vsel %vm1360_vm10, %v2538_v49, %v2539_v41 }
 0x443   : > { %v3166_v21 = vpop.permute.xlu0 %2546  ;;  %v3170_v23 = vpop.permute.xlu2 %2541 }
 0x444   : > { %v3168_v22 = vpop.permute.xlu1 %2561  ;;  %v2549_v4 = vunpack.i.h.bf16 %v3166_v21  ;;  %v2548_v7 = vunpack.i.l.bf16 %v3166_v21  ;;  %v2544_v15 = vunpack.i.h.bf16 %v3170_v23  ;;  %v2543_v16 = vunpack.i.l.bf16 %v3170_v23 }
 0x445   : > { %v2564_v27 = vunpack.i.h.bf16 %v3168_v22  ;;  %v2563_v35 = vunpack.i.l.bf16 %v3168_v22 }
 0x447   : > { %v1779_v57 = vsel %vm1388_vm8, %v2564_v27, %v2528_v25  ;;  %v1793_v25 = vsel %vm1402_vm7, %v2548_v7, %v2549_v4 }
 0x44b   : > { %v2557_v26 = vpop.permute.xlu0 %2556  ;;  %v3190_v52 = vpop.permute.xlu2 %2551 }
 0x44c   : > { %v3176_v36 = vpop.permute.xlu1 %2576  ;;  %v2559_v40 = vunpack.i.h.bf16 %v2557_v26  ;;  %v2558_v42 = vunpack.i.l.bf16 %v2557_v26  ;;  %v3235_v26 = vld [vmem:[%s3471_s9 + $0x8] sm:$0xff] }
 0x44d   : > { %v2579_v45 = vunpack.i.h.bf16 %v3176_v36  ;;  %v2578_v56 = vunpack.i.l.bf16 %v3176_v36 }
 0x44e   : > { %v1769_v43 = vsel %vm1388_vm8, %v2558_v42, %v2559_v40  ;;  %v1780_v46 = vsel %vm1388_vm8, %v2563_v35, %v2558_v42 }
 0x44f   : > { %1813 = vmatpush.msrb.mxu2 %v1769_v43  ;;  %1905 = vmatpush.msrb.mxu3 %v1780_v46  ;;  %v1717_v59 = vsel %vm1360_vm10, %v2578_v56, %v2579_v45  ;;  %v1770_v43 = vsel %vm1388_vm8, %v2559_v40, %v2563_v35 }
 0x451   : > { %1814 = vmatpush.msrb.mxu2 %v1767_v48  ;;  %1906 = vmatpush.msrb.mxu3 %v1779_v57  ;;  %v1701_v48 = vsel %vm1347_vm11, %v2543_v16, %v2544_v15  ;;  %v2554_v57 = vunpack.i.h.bf16 %v3190_v52 }
 0x453   : > { %v3186_v29 = vpop.permute.xlu0 %2566  ;;  %v3220_v12 = vpop.permute.xlu2 %2601 }
 0x454   : > { %v3192_v53 = vpop.permute.xlu1 %2586  ;;  %v2569_v54 = vunpack.i.h.bf16 %v3186_v29  ;;  %v2568_v55 = vunpack.i.l.bf16 %v3186_v29  ;;  %v2603_v42 = vunpack.i.l.bf16 %v3220_v12  ;;  %v2553_v29 = vunpack.i.l.bf16 %v3190_v52 }
 0x455   : > { %v2589_v10 = vunpack.i.h.bf16 %v3192_v53  ;;  %v2588_v11 = vunpack.i.l.bf16 %v3192_v53 }
 0x456   : > { %v1743_v37 = vsel %vm1374_vm9, %v2568_v55, %v2569_v54 }
 0x457   : > { %1815 = vmatpush.msrb.mxu2 %v1743_v37 }
 0x459   : > { %1816 = vmatpush.msrb.mxu2 %v1741_v58 }
 0x45b   : > { %v2572_v47 = vpop.permute.xlu0 %2571  ;;  %1817 = vmatpush.msrb.mxu2 %v1717_v59 }
 0x45c   : > { %v3207_v60 = vpop.permute.xlu1 %2596  ;;  %v2574_v1 = vunpack.i.h.bf16 %v2572_v47  ;;  %v2573_v2 = vunpack.i.l.bf16 %v2572_v47  ;;  %v1675_v47 = vsel %vm1333_vm12, %v2553_v29, %v2554_v57 }
 0x45d   : > { %v2599_v8 = vunpack.i.h.bf16 %v3207_v60  ;;  %v2598_v9 = vunpack.i.l.bf16 %v3207_v60  ;;  %1818 = vmatpush.msrb.mxu2 %v1715_v3 }
 0x45e   : > { %v1754_v14 = vsel %vm1374_vm9, %v2573_v2, %v2568_v55  ;;  %v1753_v19 = vsel %vm1374_vm9, %v2574_v1, %v2533_v51  ;;  %v1768_v51 = vsel %vm1388_vm8, %v2529_v24, %v2564_v27  ;;  %v1744_v59 = vsel %vm1374_vm9, %v2569_v54, %v2573_v2  ;;  %v3267_v27 = vpop.permute.xlu2 %2606 }
 0x45f   : > { %1819 = vmatpush.msrb.mxu2 %v3117_v5  ;;  %v1795_v17 = vsel %vm1402_vm7, %v2598_v9, %v2599_v8  ;;  %1907 = vmatpush.msrb.mxu3 %v1754_v14  ;;  %v2604_v5 = vunpack.i.h.bf16 %v3220_v12  ;;  %v1742_v54 = vsel %vm1374_vm9, %v2534_v50, %v2574_v1  ;;  %v2609_v2 = vunpack.i.h.bf16 %v3267_v27 }
 0x460   : > { %1850 = vmatpush.msrb.mxu0 %v1795_v17 }
 0x461   : > { %1820 = vmatpush.msrb.mxu2 %v3098_v61  ;;  %1908 = vmatpush.msrb.mxu3 %v1753_v19  ;;  %v1702_v61 = vsel %vm1347_vm11, %v2588_v11, %v2589_v10  ;;  %v1676_v22 = vsel %vm1333_vm12, %v2603_v42, %v2604_v5 }
 0x462   : > { %1851 = vmatpush.msrb.mxu0 %v1793_v25 }
 0x463   : > { %v2582_v46 = vpop.permute.xlu0 %2581  ;;  %1821 = vmatpush.msrb.mxu2 %v1702_v61  ;;  %2424 = vmatmul.msk.f32.vlgmr.msrb.gmra.mxu0 %vm798_vm2, %v3235_v26 }
 0x464   : > { %1859 = vmatpush.msra.mxu0 %v1770_v43  ;;  %v2612_v35 = vpop.permute.xlu1 %2611  ;;  %v2583_v40 = vunpack.i.l.bf16 %v2582_v46  ;;  %v2584_v58 = vunpack.i.h.bf16 %v2582_v46 }
 0x465   : > { %v2614_v55 = vunpack.i.h.bf16 %v2612_v35  ;;  %v2613_v37 = vunpack.i.l.bf16 %v2612_v35  ;;  %1822 = vmatpush.msrb.mxu2 %v1701_v48 }
 0x466   : > { %1860 = vmatpush.msra.mxu0 %v1768_v51  ;;  %v1728_v13 = vsel %vm1360_vm10, %v2583_v40, %v2578_v56  ;;  %v1727_v60 = vsel %vm1360_vm10, %v2584_v58, %v2538_v49  ;;  %v1718_v18 = vsel %vm1360_vm10, %v2579_v45, %v2583_v40  ;;  %v1716_v49 = vsel %vm1360_vm10, %v2539_v41, %v2584_v58  ;;  %v1592_v41 = vld [vmem:[%s3471_s9 + $0x18] sm:$0xff] }
 0x467   : > { %1823 = vmatpush.msrb.mxu2 %v1676_v22  ;;  %v1796_v24 = vsel %vm1402_vm7, %v2599_v8, %v2613_v37  ;;  %1909 = vmatpush.msrb.mxu3 %v1728_v13  ;;  %v1794_v56 = vsel %vm1402_vm7, %v2549_v4, %v2614_v55  ;;  %v1806_v50 = vsel %vm1402_vm7, %v2613_v37, %v2598_v9  ;;  %v2608_v45 = vunpack.i.l.bf16 %v3267_v27 }
 0x468   : > { %1861 = vmatpush.msra.mxu0 %v1744_v59  ;;  %1896 = vmatpush.msra.mxu1 %v1796_v24  ;;  %v1805_v36 = vsel %vm1402_vm7, %v2614_v55, %v2548_v7  ;;  %v2637_v7 = vpop.permute.xlu2 %2636  ;;  %vm3476_vm7 = vcmask 154624   ;;  %v1591_v55 = vld [vmem:[%s3471_s9 + $0x10] sm:$0xff] }
 0x469   : > { %1824 = vmatpush.msrb.mxu2 %v1675_v47  ;;  %1910 = vmatpush.msrb.mxu3 %v1727_v60  ;;  %v1649_v21 = vsel %vm1319_vm13, %v2608_v45, %v2609_v2  ;;  %v2639_v25 = vunpack.i.h.bf16 %v2637_v7  ;;  %v2638_v43 = vunpack.i.l.bf16 %v2637_v7  ;;  %vm3477_vm8 = vmmov %vm3476_vm7  ;;  %v2075_v60 = vld [vmem:[#allocation6 + $0xf0] sm:$0xff] }
 0x46a   : > { %1862 = vmatpush.msra.mxu0 %v1742_v54  ;;  %1897 = vmatpush.msra.mxu1 %v1794_v56  ;;  %vm3478_vm9 = vmmov %vm3476_vm7 }
 0x46b   : > { %v2592_v1 = vpop.permute.xlu0 %2591  ;;  %1911 = vmatpush.msrb.mxu3 %v3104_v63  ;;  %2426 = vmatmul.msk.f32.vlgmr.msra.gmra.mxu1 %vm798_vm2, %v3235_v26  ;;  %v1623_v12 = vsel %vm3477_vm8, %v2638_v43, %v2639_v25  ;;  %vm3479_vm10 = vmmov %vm3476_vm7 }
 0x46c   : > { %1863 = vmatpush.msra.mxu0 %v1718_v18  ;;  %1942 = vmatpush.msrb.mxu1 %v1806_v50  ;;  %v2622_v3 = vpop.permute.xlu1 %2621  ;;  %v2593_v8 = vunpack.i.l.bf16 %v2592_v1  ;;  %v2594_v14 = vunpack.i.h.bf16 %v2592_v1  ;;  %v2107_v18 = vld [vmem:[#allocation6 + $0x1f0] sm:$0xff]  ;;  %v2073_v50 = vld [vmem:[#allocation6 + $0xe0] sm:$0xff] }
 0x46d   : > { %v2624_v4 = vunpack.i.h.bf16 %v2622_v3  ;;  %v2623_v9 = vunpack.i.l.bf16 %v2622_v3  ;;  %1912 = vmatpush.msrb.mxu3 %v3107_v0  ;;  %2425 = vmatmul.msk.f32.gmra.mxu0 %vm798_vm2, %v1592_v41  ;;  %v2071_v3 = vld [vmem:[#allocation6 + $0xd0] sm:$0xff] }
 0x46e   : > { %1864 = vmatpush.msra.mxu0 %v1716_v49  ;;  %1943 = vmatpush.msrb.mxu1 %v1805_v36  ;;  %v1694_v63 = vsel %vm1347_vm11, %v2593_v8, %v2588_v11  ;;  %v1692_v0 = vsel %vm1347_vm11, %v2594_v14, %v2543_v16  ;;  %v1691_v16 = vsel %vm1347_vm11, %v2544_v15, %v2594_v14 }
 0x46f   : > { %v1650_v20 = vsel %vm1319_vm13, %v2623_v9, %v2624_v4  ;;  %1913 = vmatpush.msrb.mxu3 %v1694_v63 }
 0x470   : > { %1865 = vmatpush.msra.mxu0 %v3120_v6  ;;  %1825 = vmatpush.msrb.mxu2 %v1650_v20  ;;  %v1693_v6 = vsel %vm1347_vm11, %v2589_v10, %v2593_v8  ;;  %vm3480_vm11 = vmmov %vm3476_vm7  ;;  %v2103_v8 = vld [vmem:[#allocation6 + $0x1d0] sm:$0xff] }
 0x471   : > { %1914 = vmatpush.msrb.mxu3 %v1692_v0 }
 0x472   : > { %1866 = vmatpush.msra.mxu0 %v3101_v62  ;;  %1826 = vmatpush.msrb.mxu2 %v1649_v21 }
 0x473   : > { %v2617_v62 = vpop.permute.xlu0 %2616  ;;  %2427 = vmatmul.msk.f32.gmra.mxu1 %vm798_vm2, %v1592_v41 }
 0x474   : > { %1867 = vmatpush.msra.mxu0 %v1693_v6  ;;  %v2632_v11 = vpop.permute.xlu1 %2631  ;;  %v2619_v17 = vunpack.i.h.bf16 %v2617_v62  ;;  %v2618_v19 = vunpack.i.l.bf16 %v2617_v62 }
 0x475   : > { %v2634_v61 = vunpack.i.h.bf16 %v2632_v11  ;;  %v2633_v46 = vunpack.i.l.bf16 %v2632_v11 }
 0x476   : > { %1868 = vmatpush.msra.mxu0 %v1691_v16  ;;  %v1667_v53 = vsel %vm1333_vm12, %v2604_v5, %v2618_v19  ;;  %v1668_v10 = vsel %vm1333_vm12, %v2618_v19, %v2603_v42  ;;  %v1665_v15 = vsel %vm1333_vm12, %v2554_v57, %v2619_v17  ;;  %v1666_v48 = vsel %vm1333_vm12, %v2619_v17, %v2553_v29  ;;  %v1589_v5 = vld [vmem:[%s3471_s9] sm:$0xff]  ;;  %vm3481_vm12 = vmmov %vm3476_vm7 }
 0x477   : > { %v1624_v23 = vsel %vm3476_vm7, %v2633_v46, %v2634_v61  ;;  %1915 = vmatpush.msrb.mxu3 %v1668_v10  ;;  %v1243_v10 = vmul.f32 %v3058_v33, %v3058_v33 }
 0x478   : > { %1869 = vmatpush.msra.mxu0 %v1667_v53  ;;  %1827 = vmatpush.msrb.mxu2 %v1624_v23  ;;  %v1242_v53 = vmul.f32 %v3052_v30, %v3052_v30 }
 0x479   : > { %1916 = vmatpush.msrb.mxu3 %v1666_v48 }
 0x47a   : > { %1870 = vmatpush.msra.mxu0 %v1665_v15  ;;  %1828 = vmatpush.msrb.mxu2 %v1623_v12 }
 0x47b   : > { %v2627_v42 = vpop.permute.xlu0 %2626  ;;  %1829 = vmatmul.f32.vlgmr.msrb.gmra.mxu2 %v1589_v5  ;;  %2428 = vmatmul.msk.f32.vlgmr.msrb.gmra.mxu1 %vm798_vm2, %v3235_v26 }
 0x47c   : > { %v2629_v35 = vunpack.i.h.bf16 %v2627_v42  ;;  %v2628_v40 = vunpack.i.l.bf16 %v2627_v42  ;;  %2141 = vmatpush.msra.mxu2 %v2075_v60  ;;  %v1233_v42 = vadd.f32 %v3058_v33, %v3052_v30  ;;  %v2063_v60 = vld [vmem:[#allocation6 + $0x90] sm:$0xff] }
 0x47e   : > { %v1641_v52 = vsel %vm1319_vm13, %v2624_v4, %v2628_v40  ;;  %v1642_v57 = vsel %vm1319_vm13, %v2628_v40, %v2623_v9  ;;  %v1639_v29 = vsel %vm1319_vm13, %v2609_v2, %v2629_v35  ;;  %v1640_v51 = vsel %vm1319_vm13, %v2629_v35, %v2608_v45  ;;  %v2105_v2 = vld [vmem:[#allocation6 + $0x1e0] sm:$0xff]  ;;  %2142 = vmatpush.msra.mxu2 %v2073_v50  ;;  %v2135_v50 = vld [vmem:[#allocation6 + $0x2d0] sm:$0xff] }
 0x47f   : > { %1871 = vmatpush.msra.mxu0 %v1641_v52  ;;  %1917 = vmatpush.msrb.mxu3 %v1642_v57  ;;  %v2069_v4 = vld [vmem:[#allocation6 + $0xc0] sm:$0xff]  ;;  %v1244_v52 = vmul.f32 %v3060_v34, %v3060_v34 }
 0x480   : > { %v2101_v9 = vld [vmem:[#allocation6 + $0x1c0] sm:$0xff]  ;;  %2143 = vmatpush.msra.mxu2 %v2071_v3 }
 0x481   : > { %1872 = vmatpush.msra.mxu0 %v1639_v29  ;;  %1918 = vmatpush.msrb.mxu3 %v1640_v51  ;;  %v1234_v29 = vadd.f32 %v1233_v42, %v3060_v34  ;;  %v2061_v3 = vld [vmem:[#allocation6 + $0x80] sm:$0xff]  ;;  %v2083_v42 = vld [vmem:[#allocation6 + $0x130] sm:$0xff] }
 0x482   : > { %2144 = vmatpush.msra.mxu2 %v2069_v4  ;;  %v2133_v4 = vld [vmem:[#allocation6 + $0x2c0] sm:$0xff] }
 0x483   : > { %v2642_v37 = vpop.permute.xlu0 %2641  ;;  %1832 = vmatmul.f32.gmra.mxu2 %v1591_v55  ;;  %2429 = vmatmul.msk.f32.gmra.mxu1 %vm798_vm2, %v1592_v41 }
 0x484   : > { %v2644_v26 = vunpack.i.h.bf16 %v2642_v37  ;;  %v2643_v58 = vunpack.i.l.bf16 %v2642_v37 }
 0x486   : > { %v1615_v59 = vsel %vm3478_vm9, %v2634_v61, %v2643_v58  ;;  %v1616_v22 = vsel %vm3479_vm10, %v2643_v58, %v2633_v46  ;;  %v1613_v13 = vsel %vm3480_vm11, %v2639_v25, %v2644_v26  ;;  %v1614_v24 = vsel %vm3481_vm12, %v2644_v26, %v2638_v43 }
 0x487   : > { %1873 = vmatpush.msra.mxu0 %v1615_v59  ;;  %1919 = vmatpush.msrb.mxu3 %v1616_v22  ;;  %v2067_v59 = vld [vmem:[#allocation6 + $0xb0] sm:$0xff] }
 0x488   : > { %2145 = vmatpush.msra.mxu2 %v2067_v59  ;;  %v2139_v22 = vld [vmem:[#allocation6 + $0x2f0] sm:$0xff]  ;;  %v2077_v59 = vld [vmem:[#allocation6 + $0x100] sm:$0xff] }
 0x489   : > { %1874 = vmatpush.msra.mxu0 %v1613_v13  ;;  %1920 = vmatpush.msrb.mxu3 %v1614_v24  ;;  %v2076_v13 = vld [vmem:[#allocation6 + $0xf8] sm:$0xff]  ;;  %v2065_v24 = vld [vmem:[#allocation6 + $0xa0] sm:$0xff] }
 0x48a   : > { %1875 = vmatmul.f32.vlgmr.msra.gmra.mxu0 %v1589_v5  ;;  %1921 = vmatmul.f32.vlgmr.msrb.gmra.mxu3 %v1589_v5 }
 0x48b   : > { %2164 = vmatpush.msrb.mxu0 %v2107_v18  ;;  %2187 = vmatpush.msra.mxu1 %v2139_v22  ;;  %v2095_v18 = vld [vmem:[#allocation6 + $0x190] sm:$0xff]  ;;  %v2054_v22 = vld [vmem:[#allocation6 + $0x48] sm:$0xff] }
 0x48c   : > { %2210 = vmatpush.msra.mxu3 %v2076_v13  ;;  %2146 = vmatpush.msra.mxu2 %v2065_v24  ;;  %v2108_v13 = vld [vmem:[#allocation6 + $0x1f8] sm:$0xff] }
 0x48d   : > { %2165 = vmatpush.msrb.mxu0 %v2105_v2  ;;  %v2140_v24 = vld [vmem:[#allocation6 + $0x2f8] sm:$0xff] }
 0x48e   : > { %2147 = vmatpush.msra.mxu2 %v2063_v60  ;;  %v2138_v60 = vld [vmem:[#allocation6 + $0x2e8] sm:$0xff] }
 0x48f   : > { %2166 = vmatpush.msrb.mxu0 %v2103_v8  ;;  %v2093_v8 = vld [vmem:[#allocation6 + $0x180] sm:$0xff] }
 0x490   : > { %2148 = vmatpush.msra.mxu2 %v2061_v3  ;;  %v2104_v3 = vld [vmem:[#allocation6 + $0x1d8] sm:$0xff] }
 0x491   : > { %2167 = vmatpush.msrb.mxu0 %v2101_v9  ;;  %v2070_v9 = vld [vmem:[#allocation6 + $0xc8] sm:$0xff] }
 0x492   : > { %1878 = vmatmul.f32.gmra.mxu0 %v1591_v55  ;;  %1924 = vmatmul.f32.gmra.mxu3 %v1591_v55 }
 0x4ae   : > { %v1248_v2 = vpop.xlane.xlu0 %1247 }
 0x4e0   : > { %v1853_v27 = vpop.f32.mrf.mxu0 }
 0x4e8   : > { %v1899_v54 = vpop.f32.mrf.mxu1 }
 0x4ea   : > { %v1856_v47 = vpop.f32.mrf.mxu0 }
 0x4f0   : > { %v1902_v56 = vpop.f32.mrf.mxu1 }
 0x4f8   : > { %v1945_v14 = vpop.f32.mrf.mxu1 }
 0x4fe   : > { %v1830_v1 = vpop.f32.mrf.mxu2 }
 0x4ff   : > { %v3353_v36 = vadd.f32 %v1853_v27, %v1830_v1  ;;  %v2097_v27 = vld [vmem:[#allocation6 + $0x1a0] sm:$0xff]  ;;  %v2072_v1 = vld [vmem:[#allocation6 + $0xd8] sm:$0xff] }
 0x500   : > { %v1948_v46 = vpop.f32.mrf.mxu1 }
 0x501   : > { %v1951_v20 = vmul.f32 %v3353_v36, %v3066_v38 }
 0x503   : > { %v1967_v62 = vmul.f32 %v1951_v20, %v1951_v20 }
 0x506   : > { %v1833_v7 = vpop.f32.mrf.mxu2 }
 0x507   : > { %v1876_v49 = vpop.f32.mrf.mxu0  ;;  %v3367_v16 = vadd.f32 %v1856_v47, %v1833_v7  ;;  %v2074_v47 = vld [vmem:[#allocation6 + $0xe8] sm:$0xff]  ;;  %v2057_v7 = vld [vmem:[#allocation6 + $0x60] sm:$0xff] }
 0x508   : > { %v3355_v45 = vadd.f32 %v1899_v54, %v1876_v49  ;;  %v2137_v54 = vld [vmem:[#allocation6 + $0x2e0] sm:$0xff]  ;;  %2211 = vmatpush.msra.mxu3 %v2074_v47  ;;  %v2106_v47 = vld [vmem:[#allocation6 + $0x1e8] sm:$0xff] }
 0x509   : > { %v1954_v5 = vmul.f32 %v3367_v16, %v3066_v38  ;;  %2188 = vmatpush.msra.mxu1 %v2137_v54  ;;  %v2052_v54 = vld [vmem:[#allocation6 + $0x38] sm:$0xff] }
 0x50a   : > { %v1952_v63 = vmul.f32 %v3355_v45, %v3068_v39  ;;  %2212 = vmatpush.msra.mxu3 %v2072_v1  ;;  %v2113_v1 = vld [vmem:[#allocation6 + $0x220] sm:$0xff] }
 0x50b   : > { %v1970_v55 = vmul.f32 %v1954_v5, %v1954_v5  ;;  %2189 = vmatpush.msra.mxu1 %v2135_v50 }
 0x50c   : > { %v1968_v0 = vmul.f32 %v1952_v63, %v1952_v63  ;;  %v1957_v19 = vadd.f32 %v1952_v63, %v1951_v20  ;;  %2213 = vmatpush.msra.mxu3 %v2070_v9  ;;  %v2091_v63 = vld [vmem:[#allocation6 + $0x170] sm:$0xff]  ;;  %v1253_v20 = vmul.f32 0.00390625, %v1248_v2  ;;  %v2050_v2 = vld [vmem:[#allocation6 + $0x28] sm:$0xff] }
 0x50d   : > { %v1922_v21 = vpop.f32.mrf.mxu3  ;;  %2190 = vmatpush.msra.mxu1 %v2133_v4  ;;  %v2136_v4 = vld [vmem:[#allocation6 + $0x2d8] sm:$0xff] }
 0x50e   : > { %v3361_v41 = vadd.f32 %v1945_v14, %v1922_v21  ;;  %v1973_v61 = vadd.f32 %v1968_v0, %v1967_v62  ;;  %v2059_v14 = vld [vmem:[#allocation6 + $0x70] sm:$0xff]  ;;  %v2068_v0 = vld [vmem:[#allocation6 + $0xb8] sm:$0xff] }
 0x50f   : > { %v1879_v6 = vpop.f32.mrf.mxu0  ;;  %2149 = vmatpush.msra.mxu2 %v2059_v14  ;;  %v2131_v21 = vld [vmem:[#allocation6 + $0x2b0] sm:$0xff]  ;;  %2214 = vmatpush.msra.mxu3 %v2068_v0 }
 0x510   : > { %v1953_v11 = vmul.f32 %v3361_v41, %v3077_v44  ;;  %v3365_v17 = vadd.f32 %v1902_v56, %v1879_v6  ;;  %v1232_v56 = vpop.xlane.xlu1 %1231  ;;  %2191 = vmatpush.msra.mxu1 %v2131_v21  ;;  %v2089_v6 = vld [vmem:[#allocation6 + $0x160] sm:$0xff]  ;;  %v2111_v14 = vld [vmem:[#allocation6 + $0x210] sm:$0xff] }
 0x511   : > { %v3386_v49 = vmul.f32 0.00390625, %v1232_v56  ;;  %2150 = vmatpush.msra.mxu2 %v2057_v7  ;;  %v2134_v7 = vld [vmem:[#allocation6 + $0x2c8] sm:$0xff] }
 0x512   : > { %v1958_v25 = vadd.f32 %v1957_v19, %v1953_v11  ;;  %v1969_v43 = vmul.f32 %v1953_v11, %v1953_v11  ;;  %v1955_v23 = vmul.f32 %v3365_v17, %v3068_v39  ;;  %v1249_v39 = vadd.f32 %v1243_v10, %v1242_v53  ;;  %v2129_v11 = vld [vmem:[#allocation6 + $0x2a0] sm:$0xff]  ;;  %v2066_v19 = vld [vmem:[#allocation6 + $0xa8] sm:$0xff]  ;;  %v2064_v53 = vld [vmem:[#allocation6 + $0x98] sm:$0xff] }
 0x513   : > { %v1255_v62 = vmul.f32 %v3386_v49, %v3386_v49  ;;  %2192 = vmatpush.msra.mxu1 %v2129_v11  ;;  %2215 = vmatpush.msra.mxu3 %v2066_v19  ;;  %v2053_v10 = vld [vmem:[#allocation6 + $0x40] sm:$0xff]  ;;  %v2100_v11 = vld [vmem:[#allocation6 + $0x1b8] sm:$0xff] }
 0x514   : > { %1959 = vadd.xlane.f32.xlu2 %v1958_v25  ;;  %v1974_v15 = vadd.f32 %v1973_v61, %v1969_v43  ;;  %v1961_v40 = vadd.f32 %v1955_v23, %v1954_v5  ;;  %v1971_v51 = vmul.f32 %v1955_v23, %v1955_v23  ;;  %v1250_v38 = vadd.f32 %v1249_v39, %v1244_v52  ;;  %v2055_v25 = vld [vmem:[#allocation6 + $0x50] sm:$0xff]  ;;  %v2085_v23 = vld [vmem:[#allocation6 + $0x140] sm:$0xff]  ;;  %v2060_v52 = vld [vmem:[#allocation6 + $0x78] sm:$0xff] }
 0x515   : > { %v1925_v48 = vpop.f32.mrf.mxu3  ;;  %v2087_v43 = vld [vmem:[#allocation6 + $0x150] sm:$0xff]  ;;  %v1257_v61 = vsub.f32 %v1253_v20, %v1255_v62  ;;  %2151 = vmatpush.msra.mxu2 %v2055_v25  ;;  %2216 = vmatpush.msra.mxu3 %v2064_v53  ;;  %v2049_v39 = vld [vmem:[#allocation6 + $0x20] sm:$0xff]  ;;  %v2102_v20 = vld [vmem:[#allocation6 + $0x1c8] sm:$0xff] }
 0x516   : > { %v3377_v12 = vadd.f32 %v1948_v46, %v1925_v48  ;;  %1975 = vadd.xlane.f32.xlu1 %v1974_v15  ;;  %v1977_v26 = vadd.f32 %v1971_v51, %v1970_v55  ;;  %v2127_v46 = vld [vmem:[#allocation6 + $0x290] sm:$0xff]  ;;  %v2125_v15 = vld [vmem:[#allocation6 + $0x280] sm:$0xff]  ;;  %v2062_v48 = vld [vmem:[#allocation6 + $0x88] sm:$0xff] }
 0x517   : > { %2193 = vmatpush.msra.mxu1 %v2127_v46  ;;  %2152 = vmatpush.msra.mxu2 %v2053_v10  ;;  %v2051_v5 = vld [vmem:[#allocation6 + $0x30] sm:$0xff]  ;;  %v2058_v51 = vld [vmem:[#allocation6 + $0x68] sm:$0xff]  ;;  %v2132_v25 = vld [vmem:[#allocation6 + $0x2b8] sm:$0xff] }
 0x518   : > { %v1956_v35 = vmul.f32 %v3377_v12, %v3077_v44  ;;  %v2099_v44 = vld [vmem:[#allocation6 + $0x1b0] sm:$0xff]  ;;  %2217 = vmatpush.msra.mxu3 %v2062_v48  ;;  %v2046_v62 = vld [vmem:[#allocation6 + $0x8] sm:$0xff]  ;;  %v2128_v48 = vld [vmem:[#allocation6 + $0x298] sm:$0xff] }
 0x519   : > { %2168 = vmatpush.msrb.mxu0 %v2099_v44  ;;  %2194 = vmatpush.msra.mxu1 %v2125_v15  ;;  %v2079_v55 = vld [vmem:[#allocation6 + $0x110] sm:$0xff]  ;;  %v2117_v44 = vld [vmem:[#allocation6 + $0x240] sm:$0xff] }
 0x51a   : > { %v1962_v57 = vadd.f32 %v1961_v40, %v1956_v35  ;;  %v1972_v37 = vmul.f32 %v1956_v35, %v1956_v35  ;;  %v3390_v35 = vadd.f32 1e-05, %v1257_v61  ;;  %2153 = vmatpush.msra.mxu2 %v2051_v5  ;;  %v2123_v40 = vld [vmem:[#allocation6 + $0x270] sm:$0xff]  ;;  %2218 = vmatpush.msra.mxu3 %v2060_v52  ;;  %v2130_v61 = vld [vmem:[#allocation6 + $0x2a8] sm:$0xff] }
 0x51b   : > { %2169 = vmatpush.msrb.mxu0 %v2097_v27  ;;  %2195 = vmatpush.msra.mxu1 %v2123_v40  ;;  %v2115_v27 = vld [vmem:[#allocation6 + $0x230] sm:$0xff]  ;;  %v2094_v40 = vld [vmem:[#allocation6 + $0x188] sm:$0xff] }
 0x51c   : > { %1963 = vadd.xlane.f32.xlu0 %v1962_v57  ;;  %1235 = vadd.xlane.f32.xlu2 %v1234_v29  ;;  %v1978_v58 = vadd.f32 %v1977_v26, %v1972_v37  ;;  %v2081_v57 = vld [vmem:[#allocation6 + $0x120] sm:$0xff]  ;;  %2651 = vrsqrt.f32 %v3390_v35  ;;  %v2119_v37 = vld [vmem:[#allocation6 + $0x250] sm:$0xff]  ;;  %v2056_v26 = vld [vmem:[#allocation6 + $0x58] sm:$0xff]  ;;  %vm1273_vm13 = vweird.f32 %v3390_v35 }
 0x51d   : > { %2170 = vmatpush.msrb.mxu0 %v2095_v18  ;;  %2154 = vmatpush.msra.mxu2 %v2049_v39  ;;  %v2121_v29 = vld [vmem:[#allocation6 + $0x260] sm:$0xff]  ;;  %v2126_v52 = vld [vmem:[#allocation6 + $0x288] sm:$0xff] }
 0x51e   : > { %1251 = vadd.xlane.f32.xlu1 %v1250_v38  ;;  %2196 = vmatpush.msra.mxu1 %v2121_v29  ;;  %v2047_v38 = vld [vmem:[#allocation6 + $0x10] sm:$0xff] }
 0x51f   : > { %2171 = vmatpush.msrb.mxu0 %v2093_v8  ;;  %2219 = vmatpush.msra.mxu3 %v2058_v51  ;;  %v2092_v51 = vld [vmem:[#allocation6 + $0x178] sm:$0xff] }
 0x520   : > { %2155 = vmatpush.msra.mxu2 %v2047_v38  ;;  %2197 = vmatpush.msra.mxu1 %v2119_v37 }
 0x521   : > { %2172 = vmatpush.msrb.mxu0 %v2091_v63  ;;  %2220 = vmatpush.msra.mxu3 %v2056_v26  ;;  %v2048_v63 = vld [vmem:[#allocation6 + $0x18] sm:$0xff]  ;;  %v2090_v26 = vld [vmem:[#allocation6 + $0x168] sm:$0xff] }
 0x522   : > { %2198 = vmatpush.msra.mxu1 %v2117_v44  ;;  %v3393_v18 = vpop.eup %2651 }
 0x523   : > { %2173 = vmatpush.msrb.mxu0 %v2089_v6  ;;  %2221 = vmatpush.msra.mxu3 %v2054_v22  ;;  %v1268_v21 = vmul.f32 %v3393_v18, %v3390_v35  ;;  %v2109_v6 = vld [vmem:[#allocation6 + $0x200] sm:$0xff]  ;;  %vm1274_vm2 = vweird.f32 %v3393_v18 }
 0x524   : > { %1979 = vadd.xlane.f32.xlu2 %v1978_v58  ;;  %v2045_v58 = vld [vmem:[#allocation6] sm:$0xff]  ;;  %2199 = vmatpush.msra.mxu1 %v2115_v27  ;;  %vm1275_vm14 = vmor %vm1273_vm13, %vm1274_vm2 }
 0x525   : > { %2174 = vmatpush.msrb.mxu0 %v2087_v43  ;;  %2156 = vmatpush.msra.mxu2 %v2045_v58  ;;  %v2098_v43 = vld [vmem:[#allocation6 + $0x1a8] sm:$0xff]  ;;  %v1269_v46 = vmul.f32 %v3393_v18, %v1268_v21 }
 0x526   : > { %2222 = vmatpush.msra.mxu3 %v2052_v54  ;;  %2200 = vmatpush.msra.mxu1 %v2113_v1  ;;  %v2122_v58 = vld [vmem:[#allocation6 + $0x268] sm:$0xff] }
 0x527   : > { %2175 = vmatpush.msrb.mxu0 %v2085_v23  ;;  %2233 = vmatpush.msrb.mxu2 %v2108_v13  ;;  %v2096_v23 = vld [vmem:[#allocation6 + $0x198] sm:$0xff]  ;;  %v1270_v39 = vmul.f32 0.5, %v1269_v46 }
 0x528   : > { %2223 = vmatpush.msra.mxu3 %v2050_v2  ;;  %2201 = vmatpush.msra.mxu1 %v2111_v14 }
 0x529   : > { %2176 = vmatpush.msrb.mxu0 %v2083_v42  ;;  %2234 = vmatpush.msrb.mxu2 %v2106_v47  ;;  %v1271_v44 = vsub.f32 1.5, %v1270_v39 }
 0x52a   : > { %2224 = vmatpush.msra.mxu3 %v2048_v63  ;;  %2202 = vmatpush.msra.mxu1 %v2109_v6  ;;  %v2116_v63 = vld [vmem:[#allocation6 + $0x238] sm:$0xff] }
 0x52b   : > { %2177 = vmatpush.msrb.mxu0 %v2081_v57  ;;  %2235 = vmatpush.msrb.mxu2 %v2104_v3  ;;  %v2118_v3 = vld [vmem:[#allocation6 + $0x248] sm:$0xff] }
 0x52c   : > { %2225 = vmatpush.msra.mxu3 %v2046_v62  ;;  %v2080_v62 = vld [vmem:[#allocation6 + $0x118] sm:$0xff] }
 0x52d   : > { %2178 = vmatpush.msrb.mxu0 %v2079_v55  ;;  %2236 = vmatpush.msrb.mxu2 %v2102_v20  ;;  %v2124_v55 = vld [vmem:[#allocation6 + $0x278] sm:$0xff]  ;;  %v2082_v20 = vld [vmem:[#allocation6 + $0x128] sm:$0xff] }
 0x52f   : > { %2179 = vmatpush.msrb.mxu0 %v2077_v59  ;;  %2237 = vmatpush.msrb.mxu2 %v2100_v11  ;;  %v1259_v11 = vsub.f32 %v3050_v28, %v3386_v49  ;;  %v2078_v28 = vld [vmem:[#allocation6 + $0x108] sm:$0xff] }
 0x531   : > { %2256 = vmatpush.msra.mxu0 %v2140_v24  ;;  %2238 = vmatpush.msrb.mxu2 %v2098_v43  ;;  %v2088_v24 = vld [vmem:[#allocation6 + $0x158] sm:$0xff]  ;;  %v1260_v43 = vsub.f32 %v3054_v31, %v3386_v49  ;;  %v2110_v31 = vld [vmem:[#allocation6 + $0x208] sm:$0xff] }
 0x533   : > { %2257 = vmatpush.msra.mxu0 %v2138_v60  ;;  %2239 = vmatpush.msrb.mxu2 %v2096_v23  ;;  %v2086_v60 = vld [vmem:[#allocation6 + $0x148] sm:$0xff] }
 0x535   : > { %2258 = vmatpush.msra.mxu0 %v2136_v4  ;;  %2240 = vmatpush.msrb.mxu2 %v2094_v40  ;;  %v2084_v4 = vld [vmem:[#allocation6 + $0x138] sm:$0xff] }
 0x537   : > { %2259 = vmatpush.msra.mxu0 %v2134_v7  ;;  %2241 = vmatpush.msrb.mxu2 %v2092_v51 }
 0x539   : > { %2260 = vmatpush.msra.mxu0 %v2132_v25  ;;  %2242 = vmatpush.msrb.mxu2 %v2090_v26  ;;  %v2112_v25 = vld [vmem:[#allocation6 + $0x218] sm:$0xff] }
 0x53b   : > { %2261 = vmatpush.msra.mxu0 %v2130_v61  ;;  %2243 = vmatpush.msrb.mxu2 %v2088_v24 }
 0x53d   : > { %2262 = vmatpush.msra.mxu0 %v2128_v48  ;;  %2244 = vmatpush.msrb.mxu2 %v2086_v60 }
 0x53f   : > { %2263 = vmatpush.msra.mxu0 %v2126_v52  ;;  %2245 = vmatpush.msrb.mxu2 %v2084_v4 }
 0x541   : > { %2264 = vmatpush.msra.mxu0 %v2124_v55  ;;  %2246 = vmatpush.msrb.mxu2 %v2082_v20 }
 0x543   : > { %2265 = vmatpush.msra.mxu0 %v2122_v58  ;;  %2247 = vmatpush.msrb.mxu2 %v2080_v62 }
 0x545   : > { %2248 = vmatpush.msrb.mxu2 %v2078_v28 }
 0x587   : > { %v1960_v56 = vpop.xlane.xlu2 %1959 }
 0x588   : > { %v3395_v50 = vmul.f32 0.00390625, %v1960_v56  ;;  %v2120_v56 = vld [vmem:[#allocation6 + $0x258] sm:$0xff] }
 0x589   : > { %v1976_v8 = vpop.xlane.xlu1 %1975  ;;  %2266 = vmatpush.msra.mxu0 %v2120_v56 }
 0x58a   : > { %v1981_v9 = vmul.f32 0.00390625, %v1976_v8  ;;  %v1983_v0 = vmul.f32 %v3395_v50, %v3395_v50  ;;  %v1272_v8 = vmul.f32 %v3393_v18, %v1271_v44  ;;  %v1987_v61 = vsub.f32 %v3353_v36, %v3395_v50 }
 0x58b   : > { %2267 = vmatpush.msra.mxu0 %v2118_v3  ;;  %v1989_v46 = vsub.f32 %v3361_v41, %v3395_v50 }
 0x58c   : > { %v1985_v19 = vsub.f32 %v1981_v9, %v1983_v0  ;;  %v2114_v0 = vld [vmem:[#allocation6 + $0x228] sm:$0xff]  ;;  %v1276_v6 = vsel %vm1275_vm14, %v3393_v18, %v1272_v8  ;;  %v1988_v18 = vsub.f32 %v3355_v45, %v3395_v50 }
 0x58d   : > { %2268 = vmatpush.msra.mxu0 %v2116_v63  ;;  %v1287_v48 = vmul.f32 %v1276_v6, %v1259_v11  ;;  %v1288_v36 = vmul.f32 %v1276_v6, %v1260_v43 }
 0x58e   : > { %v3402_v53 = vadd.f32 1e-05, %v1985_v19 }
 0x58f   : > { %v1236_v10 = vpop.xlane.xlu2 %1235  ;;  %v1964_v5 = vpop.xlane.xlu0 %1963  ;;  %2269 = vmatpush.msra.mxu0 %v2114_v0 }
 0x590   : > { %v3404_v15 = vmul.f32 0.00390625, %v1236_v10  ;;  %2653 = vrsqrt.f32 %v3402_v53  ;;  %v3409_v38 = vmul.f32 0.00390625, %v1964_v5  ;;  %vm2001_vm6 = vweird.f32 %v3402_v53 }
 0x591   : > { %v1252_v42 = vpop.xlane.xlu1 %1251  ;;  %2270 = vmatpush.msra.mxu0 %v2112_v25 }
 0x592   : > { %v1254_v57 = vmul.f32 0.00390625, %v1252_v42  ;;  %v1256_v29 = vmul.f32 %v3404_v15, %v3404_v15  ;;  %v1984_v54 = vmul.f32 %v3409_v38, %v3409_v38  ;;  %v1991_v60 = vsub.f32 %v3365_v17, %v3409_v38 }
 0x593   : > { %2271 = vmatpush.msra.mxu0 %v2110_v31 }
 0x594   : > { %v1258_v37 = vsub.f32 %v1254_v57, %v1256_v29 }
 0x596   : > { %v2654_v59 = vpop.eup %2653  ;;  %v3411_v22 = vadd.f32 1e-05, %v1258_v37 }
 0x597   : > { %v1980_v13 = vpop.xlane.xlu2 %1979  ;;  %v1996_v27 = vmul.f32 %v2654_v59, %v3402_v53  ;;  %vm2002_vm5 = vweird.f32 %v2654_v59  ;;  %v1261_v53 = vsub.f32 %v3056_v32, %v3386_v49 }
 0x598   : > { %v1982_v47 = vmul.f32 0.00390625, %v1980_v13  ;;  %2655 = vrsqrt.f32 %v3411_v22  ;;  %vm2003_vm15 = vmor %vm2001_vm6, %vm2002_vm5  ;;  %vm1283_vm7 = vweird.f32 %v3411_v22 }
 0x599   : > { %v1997_v1 = vmul.f32 %v2654_v59, %v1996_v27  ;;  %v1289_v41 = vmul.f32 %v1276_v6, %v1261_v53 }
 0x59a   : > { %v1986_v2 = vsub.f32 %v1982_v47, %v1984_v54  ;;  %v1262_v54 = vsub.f32 %v3052_v30, %v3404_v15  ;;  %v1263_v47 = vsub.f32 %v3058_v33, %v3404_v15 }
 0x59b   : > { %v1998_v9 = vmul.f32 0.5, %v1997_v1  ;;  %v1992_v1 = vsub.f32 %v3377_v12, %v3409_v38 }
 0x59c   : > { %v3419_v14 = vadd.f32 1e-05, %v1986_v2  ;;  %v1264_v2 = vsub.f32 %v3060_v34, %v3404_v15 }
 0x59d   : > { %v1999_v21 = vsub.f32 1.5, %v1998_v9 }
 0x59e   : > { %2657 = vrsqrt.f32 %v3419_v14  ;;  %v2656_v7 = vpop.eup %2655  ;;  %vm2011_vm10 = vweird.f32 %v3419_v14 }
 0x59f   : > { %v2000_v19 = vmul.f32 %v2654_v59, %v1999_v21  ;;  %v1278_v35 = vmul.f32 %v2656_v7, %v3411_v22  ;;  %vm1284_vm0 = vweird.f32 %v2656_v7  ;;  %v1990_v22 = vsub.f32 %v3367_v16, %v3409_v38 }
 0x5a0   : > { %vm1285_vm8 = vmor %vm1283_vm7, %vm1284_vm0 }
 0x5a1   : > { %v2004_v10 = vsel %vm2003_vm15, %v2654_v59, %v2000_v19  ;;  %v1279_v23 = vmul.f32 %v2656_v7, %v1278_v35 }
 0x5a2   : > { %v2015_v5 = vmul.f32 %v2004_v10, %v1987_v61  ;;  %v2016_v42 = vmul.f32 %v2004_v10, %v1988_v18  ;;  %v2017_v40 = vmul.f32 %v2004_v10, %v1989_v46 }
 0x5a3   : > { %v1280_v52 = vmul.f32 0.5, %v1279_v23 }
 0x5a4   : > { %v2658_v45 = vpop.eup %2657  ;;  %v2021_v39 = vadd.f32 %v2015_v5, %v1287_v48  ;;  %v2022_v57 = vadd.f32 %v2016_v42, %v1288_v36  ;;  %v2023_v49 = vadd.f32 %v2017_v40, %v1289_v41 }
 0x5a5   : > { %v2006_v50 = vmul.f32 %v2658_v45, %v3419_v14  ;;  %v1281_v32 = vsub.f32 1.5, %v1280_v52  ;;  %vm2012_vm9 = vweird.f32 %v2658_v45 }
 0x5a6   : > { %vm2027_vm1 = vcmp.ge.f32.partialorder %v2021_v39, 0.0  ;;  %v2033_v51 = vmul.f32 0.2, %v2021_v39  ;;  %vm2028_vm3 = vcmp.ge.f32.partialorder %v2022_v57, 0.0  ;;  %v2034_v37 = vmul.f32 0.2, %v2022_v57  ;;  %vm2013_vm11 = vmor %vm2011_vm10, %vm2012_vm9 }
 0x5a7   : > { %v2007_v29 = vmul.f32 %v2658_v45, %v2006_v50  ;;  %v1282_v55 = vmul.f32 %v2656_v7, %v1281_v32  ;;  %vm2029_vm4 = vcmp.ge.f32.partialorder %v2023_v49, 0.0  ;;  %v2035_v26 = vmul.f32 0.2, %v2023_v49 }
 0x5a8   : > { %v2039_v59 = vsel %vm2027_vm1, %v2021_v39, %v2033_v51  ;;  %v2040_v44 = vsel %vm2028_vm3, %v2022_v57, %v2034_v37 }
 0x5a9   : > { %v2008_v58 = vmul.f32 0.5, %v2007_v29  ;;  %2157 = vmatmul.f32.vlgmr.msra.gmra.mxu2 %v2039_v59  ;;  %v2041_v13 = vsel %vm2029_vm4, %v2023_v49, %v2035_v26  ;;  %2226 = vmatmul.f32.vlgmr.msra.gmra.mxu3 %v2039_v59  ;;  %v1286_v27 = vsel %vm1285_vm8, %v2656_v7, %v1282_v55 }
 0x5aa   : > { %2180 = vmatmul.f32.vlgmr.msrb.gmra.mxu0 %v2040_v44  ;;  %2203 = vmatmul.f32.vlgmr.msra.gmra.mxu1 %v2041_v13  ;;  %v1290_v30 = vmul.f32 %v1286_v27, %v1262_v54  ;;  %v1291_v8 = vmul.f32 %v1286_v27, %v1263_v47  ;;  %v1292_v9 = vmul.f32 %v1286_v27, %v1264_v2 }
 0x5ab   : > { %v2009_v24 = vsub.f32 1.5, %v2008_v58 }
 0x5ad   : > { %v2010_v56 = vmul.f32 %v2658_v45, %v2009_v24 }
 0x5af   : > { %v2014_v3 = vsel %vm2013_vm11, %v2658_v45, %v2010_v56 }
 0x5b0   : > { %v2018_v33 = vmul.f32 %v2014_v3, %v1990_v22  ;;  %v2019_v4 = vmul.f32 %v2014_v3, %v1991_v60  ;;  %v2020_v14 = vmul.f32 %v2014_v3, %v1992_v1 }
 0x5b2   : > { %v2024_v63 = vadd.f32 %v2018_v33, %v1290_v30  ;;  %v2025_v20 = vadd.f32 %v2019_v4, %v1291_v8  ;;  %v2026_v16 = vadd.f32 %v2020_v14, %v1292_v9 }
 0x5b4   : > { %vm2030_vm12 = vcmp.ge.f32.partialorder %v2024_v63, 0.0  ;;  %v2036_v21 = vmul.f32 0.2, %v2024_v63  ;;  %vm2031_vm2 = vcmp.ge.f32.partialorder %v2025_v20, 0.0  ;;  %v2037_v17 = vmul.f32 0.2, %v2025_v20 }
 0x5b5   : > { %vm2032_vm13 = vcmp.ge.f32.partialorder %v2026_v16, 0.0  ;;  %v2038_v12 = vmul.f32 0.2, %v2026_v16 }
 0x5b6   : > { %v2042_v38 = vsel %vm2030_vm12, %v2024_v63, %v2036_v21  ;;  %v2043_v34 = vsel %vm2031_vm2, %v2025_v20, %v2037_v17 }
 0x5b7   : > { %2160 = vmatmul.f32.gmra.mxu2 %v2042_v38  ;;  %2183 = vmatmul.f32.gmra.mxu0 %v2043_v34  ;;  %v2044_v15 = vsel %vm2032_vm13, %v2026_v16, %v2038_v12 }
 0x5b8   : > { %2206 = vmatmul.f32.gmra.mxu1 %v2044_v15  ;;  %2229 = vmatmul.f32.gmra.mxu3 %v2042_v38 }
 0x5bf   : > { %2249 = vmatmul.f32.vlgmr.msrb.gmra.mxu2 %v2040_v44  ;;  %2272 = vmatmul.f32.vlgmr.msra.gmra.mxu0 %v2041_v13 }
 0x5c7   : > { %2252 = vmatmul.f32.gmra.mxu2 %v2043_v34  ;;  %2275 = vmatmul.f32.gmra.mxu0 %v2044_v15 }
 0x627   : > { %v2181_v0 = vpop.f32.mrf.mxu0  ;;  %v2204_v62 = vpop.f32.mrf.mxu1 }
 0x62c   : > { %v2158_v7 = vpop.f32.mrf.mxu2  ;;  %v2227_v18 = vpop.f32.mrf.mxu3 }
 0x62d   : > { %v2182_v6 = vadd.f32 %v2181_v0, %v2158_v7 }
 0x62f   : > { %v2205_v11 = vadd.f32 %v2204_v62, %v2182_v6 }
 0x631   : > { %2279 = vst [vmem:[%s426_s21] sm:$0xff] %v2205_v11 }
 0x634   : > { %v2184_v19 = vpop.f32.mrf.mxu0 }
 0x635   : > { %v2207_v43 = vpop.f32.mrf.mxu1 }
 0x63a   : > { %v2161_v35 = vpop.f32.mrf.mxu2 }
 0x63b   : > { %v2185_v25 = vadd.f32 %v2184_v19, %v2161_v35  ;;  %v2230_v23 = vpop.f32.mrf.mxu3 }
 0x63c   : > { %v2273_v46 = vpop.f32.mrf.mxu0 }
 0x63d   : > { %v2208_v61 = vadd.f32 %v2207_v43, %v2185_v25 }
 0x63f   : > { %2281 = vst [vmem:[%s426_s21 + $0x10] sm:$0xff] %v2208_v61 }
 0x642   : > { %v2250_v28 = vpop.f32.mrf.mxu2 }
 0x643   : > { %v2251_v53 = vadd.f32 %v2250_v28, %v2227_v18 }
 0x644   : > { %v2276_v5 = vpop.f32.mrf.mxu0 }
 0x645   : > { %v2274_v10 = vadd.f32 %v2273_v46, %v2251_v53 }
 0x647   : > { %2280 = vst [vmem:[%s426_s21 + $0x8] sm:$0xff] %v2274_v10 }
 0x64a   : > { %v2253_v48 = vpop.f32.mrf.mxu2 }
 0x64b   : > { %v2254_v31 = vadd.f32 %v2253_v48, %v2230_v23 }
 0x64d   : > { %v2277_v36 = vadd.f32 %v2276_v5, %v2254_v31 }
 0x64f   : > { %2282 = vst [vmem:[%s426_s21 + $0x18] sm:$0xff] %v2277_v36 }
 0x650 PF: > { %s22_s13 = sadd.s32 1, %s2763_s13  }
 0x651   : > { %p19_p7 = scmp.ge.s32.totalorder %s22_s13, 4  }
 0x653   :  { %21 = sbr.rel (!%p19_p7) target bundleno = 2 (0x2), region = 109 }
 0x658   :  { %2304 = vsyncpa [#allocation3], 1 }
 0x659   :  { %2306 = vsyncpa [#allocation3 + $0x1], 1 }
 0x65a   :  { %2307 = vsyncpa [#allocation5], 1 }

</bundles_post_ra>
